<compile_context>
chip_gen: v6e
topology: v6e:2x2x1
jax: 0.10.0
libtpu: 0.0.40
codegen_flags: <defaults>
</compile_context>

<pallas_src>
import functools
import math

import jax
import jax.numpy as jnp
from jax.experimental import pallas as pl
from jax.experimental.pallas import tpu as pltpu


def latent_head_kernel(x_ref, wqf_ref, wlat_ref, wkv_ref, cos_ref, sin_ref,
                       o_ref, q_scr, m_scr, l_scr, acc_scr, *, tkv, n_kv):
    """One batch element per grid step along axis 0; kv tiles along axis 1."""
    j = pl.program_id(1)
    mxu = wqf_ref.dtype
    Hp = o_ref.shape[-1]          # 128-lane padded head width

    @pl.when(j == 0)
    def _init():
        # Fused query projection: x_aug @ [Wq_p | Wq_p @ R]  (bias folded via
        # the ones column; 1/sqrt(H) folded into the weights/bias).
        projq = jnp.dot(x_ref[...].astype(mxu), wqf_ref[...],
                        preferred_element_type=jnp.float32)        # (T, 2*Hp)
        q = projq[:, :Hp]                                          # aligned view
        q_rh = projq[:, Hp:]                                       # rotate_half(q)
        # RoPE in f32, stored once as bf16 (matmul LHS for every kv step).
        q_scr[...] = (q * cos_ref[...] + q_rh * sin_ref[...]).astype(mxu)
        m_scr[...] = jnp.full(m_scr.shape, -jnp.inf, dtype=m_scr.dtype)
        l_scr[...] = jnp.zeros(l_scr.shape, dtype=l_scr.dtype)
        acc_scr[...] = jnp.zeros(acc_scr.shape, dtype=acc_scr.dtype)

    # --- kv tile of this batch element (sublane slice at a multiple of tkv) ---
    r0 = pl.multiple_of(j * tkv, tkv)
    x_kv = x_ref[pl.ds(r0, tkv), :]
    cos_kv = cos_ref[pl.ds(r0, tkv), :]
    sin_kv = sin_ref[pl.ds(r0, tkv), :]

    # latent projection (wa_k | wa_v packed in one 128-lane segment) ...
    lat = jnp.dot(x_kv.astype(mxu), wlat_ref[...],
                  preferred_element_type=jnp.float32)               # (tkv, Hp)
    # ... then latent -> [ k | rotate_half(k) | v ] in one MXU pass.
    kv = jnp.dot(lat.astype(mxu), wkv_ref[...],
                 preferred_element_type=jnp.float32)                # (tkv, 3*Hp)
    k = kv[:, :Hp]
    k_rh = kv[:, Hp:2 * Hp]
    v = kv[:, 2 * Hp:]
    k_rot = (k * cos_kv + k_rh * sin_kv).astype(mxu)

    # scores (scale already folded into query weights); rhs contracted on its
    # last dim -> no materialized transpose.
    s = jax.lax.dot_general(q_scr[...], k_rot, (((1,), (1,)), ((), ())),
                            preferred_element_type=jnp.float32)     # (T, tkv)

    # online softmax update (f32)
    m_prev = m_scr[...]
    m_new = jnp.maximum(m_prev, jnp.max(s, axis=-1, keepdims=True))
    alpha = jnp.exp(m_prev - m_new)
    p = jnp.exp(s - m_new)
    l_scr[...] = alpha * l_scr[...] + jnp.sum(p, axis=-1, keepdims=True)
    acc_scr[...] = alpha * acc_scr[...] + jnp.dot(
        p.astype(mxu), v.astype(mxu), preferred_element_type=jnp.float32)
    m_scr[...] = m_new

    @pl.when(j == n_kv - 1)
    def _finalize():
        # dropout is identity in eval mode
        o_ref[...] = (acc_scr[...] *
                      pl.reciprocal(l_scr[...], approx=True)).astype(o_ref.dtype)


def _prepare_fused_params(wq, bq, wak, wbk, wav, wbv, cos, sin, mxu_dtype,
                          seg=128):
    """One-time weight prep (outside the kernel): permute / scale / fuse / pad."""
    C, H = wq.shape
    L = wak.shape[1]
    h2 = H // 2
    Hp = ((H + seg - 1) // seg) * seg          # 128-lane aligned segment width
    scale = 1.0 / math.sqrt(H)

    # Permute output features to [even..., odd...] so RoPE's strided split
    # becomes a contiguous half-split; fold 1/sqrt(H) into the query path.
    perm = jnp.concatenate([jnp.arange(0, H, 2), jnp.arange(1, H, 2)])
    wq_p = wq[:, perm] * scale
    bq_p = bq[perm] * scale
    wbk_p = wbk[:, perm]

    # Signed rotate-half matrix:  [a | b] @ R = [-b | a]
    eye = jnp.eye(h2, dtype=wq.dtype)
    zer = jnp.zeros((h2, h2), dtype=wq.dtype)
    R = jnp.block([[zer, eye], [-eye, zer]])                       # (H, H)

    def pad_cols(m, width):
        return jnp.pad(m, ((0, 0), (0, width - m.shape[1])))

    # Query weight with the bias folded in as the last row (ones column on x):
    # (C+1, 2*Hp) = [ q-segment | rotate_half(q)-segment ], each 128-aligned.
    wq_seg = pad_cols(jnp.vstack([wq_p, bq_p[None, :]]), Hp)
    wqr_seg = pad_cols(jnp.vstack([wq_p @ R, (bq_p @ R)[None, :]]), Hp)
    wqf = jnp.concatenate([wq_seg, wqr_seg], axis=1)

    # Latent projection: [wa_k | wa_v] packed into a single 128-lane segment,
    # zero "bias" row for the ones column.  (C+1, Hp)
    wlat = pad_cols(jnp.vstack([jnp.concatenate([wak, wav], axis=1),
                                jnp.zeros((1, 2 * L), dtype=wak.dtype)]), Hp)

    # Latent -> [ k | rotate_half(k) | v ], each segment 128-aligned. (Hp, 3*Hp)
    wkv = jnp.zeros((Hp, 3 * Hp), dtype=wbk.dtype)
    wkv = wkv.at[:L, 0:H].set(wbk_p)
    wkv = wkv.at[:L, Hp:Hp + H].set(wbk_p @ R)
    wkv = wkv.at[L:2 * L, 2 * Hp:2 * Hp + H].set(wbv)

    # Full-width trig tables (duplicated over the two halves, lane-padded).
    cosF = pad_cols(jnp.concatenate([cos, cos], axis=-1), Hp)       # (T, Hp)
    sinF = pad_cols(jnp.concatenate([sin, sin], axis=-1), Hp)

    return (wqf.astype(mxu_dtype), wlat.astype(mxu_dtype), wkv.astype(mxu_dtype),
            cosF.astype(jnp.float32), sinF.astype(jnp.float32), Hp)


def latent_head(x, wq, bq, wak, wbk, wav, wbv, cos, sin, *, tkv=None,
                mxu_dtype=jnp.bfloat16):
    """x: (B, T, C); Linear weights stored (in, out) so y = x @ W (+ b)."""
    B, T, C = x.shape
    H = wq.shape[1]
    if tkv is None:
        tkv = 256 if (T % 256 == 0) else T
    assert T % tkv == 0, "T must be a multiple of the kv tile"
    assert tkv % 8 == 0 or tkv == T, "kv tile must be sublane (8) aligned"
    n_kv = T // tkv

    wqf, wlat, wkv, cosF, sinF, Hp = _prepare_fused_params(
        wq, bq, wak, wbk, wav, wbv, cos, sin, mxu_dtype)

    # Wrapper-side layout plumbing: fold batch into rows and append a ones
    # column so the query bias rides inside the fused matmul.
    ones = jnp.ones((B, T, 1), dtype=x.dtype)
    x_flat = jnp.concatenate([x, ones], axis=-1).reshape(B * T, C + 1)

    kernel = functools.partial(latent_head_kernel, tkv=tkv, n_kv=n_kv)

    def build(buffered):
        def wspec(shape):
            # Grid-invariant blocks: a single buffer is enough (they are DMA'd
            # once); default double buffering just wastes VMEM headroom.
            if buffered:
                return pl.BlockSpec(shape, lambda b, j: (0, 0),
                                    pipeline_mode=pl.Buffered(1))
            return pl.BlockSpec(shape, lambda b, j: (0, 0))

        grid_spec = pltpu.PrefetchScalarGridSpec(
            num_scalar_prefetch=0,
            grid=(B, n_kv),
            in_specs=[
                pl.BlockSpec((T, C + 1), lambda b, j: (b, 0)),   # x rows (one batch elem)
                wspec((C + 1, 2 * Hp)),                          # fused q weight (+bias row)
                wspec((C + 1, Hp)),                              # fused latent weight
                wspec((Hp, 3 * Hp)),                             # latent -> k|k_rh|v
                wspec((T, Hp)),                                  # cos (lane padded)
                wspec((T, Hp)),                                  # sin (lane padded)
            ],
            out_specs=pl.BlockSpec((T, Hp), lambda b, j: (b, 0)),
            scratch_shapes=[
                pltpu.VMEM((T, Hp), mxu_dtype),    # rotated q (matmul LHS)
                pltpu.VMEM((T, 1), jnp.float32),   # running max
                pltpu.VMEM((T, 1), jnp.float32),   # running denom
                pltpu.VMEM((T, Hp), jnp.float32),  # output accumulator
            ],
        )
        return pl.pallas_call(
            kernel,
            out_shape=jax.ShapeDtypeStruct((B * T, Hp), x.dtype),
            grid_spec=grid_spec,
            compiler_params=pltpu.CompilerParams(
                dimension_semantics=("parallel", "arbitrary"),
                vmem_limit_bytes=32 * 1024 * 1024),
        )

    try:
        out_flat = jax.block_until_ready(
            build(True)(x_flat, wqf, wlat, wkv, cosF, sinF))
    except Exception:
        # pipeline_mode=pl.Buffered may be unsupported on this jax version;
        # fall back to default double buffering (weights are small here).
        out_flat = build(False)(x_flat, wqf, wlat, wkv, cosF, sinF)

    # TODO(synk): pack n_heads*H into the last axis at the caller so the HBM
    # output is lane-dense; a single H=16 head forces this wrapper-side slice.
    return out_flat[:, :H].reshape(B, T, H)


def reference(x, wq, bq, wak, wbk, wav, wbv, cos, sin):
    """Pure-JAX f32 reproduction of the PyTorch forward (original weight order)."""
    q = x @ wq + bq
    k = (x @ wak) @ wbk
    v = (x @ wav) @ wbv
    q1, q2 = q[..., ::2], q[..., 1::2]
    k1, k2 = k[..., ::2], k[..., 1::2]
    c, s = cos[None], sin[None]
    q_rot = jnp.concatenate([q1 * c - q2 * s, q1 * s + q2 * c], axis=-1)
    k_rot = jnp.concatenate([k1 * c - k2 * s, k1 * s + k2 * c], axis=-1)
    scores = q_rot @ jnp.swapaxes(k_rot, -2, -1) / (k.shape[-1] ** 0.5)
    attn = jax.nn.softmax(scores, axis=-1)
    return attn @ v


if __name__ == "__main__":
    # small shapes consistent with the module
    B, T, C = 2, 16, 32          # batch, seq, d_model
    H = 16                       # head_size
    L = max(1, H // 2)           # latent_dim
    block_size = 16

    key = jax.random.PRNGKey(0)
    k0, k1, k2, k3, k4, k5, k6 = jax.random.split(key, 7)

    x = jax.random.normal(k0, (B, T, C), dtype=jnp.float32)
    # Linear weights stored (in, out) so y = x @ W (+ b)
    wq = jax.random.normal(k1, (C, H), dtype=jnp.float32) * 0.05
    bq = jax.random.normal(k2, (H,), dtype=jnp.float32) * 0.05
    wak = jax.random.normal(k3, (C, L), dtype=jnp.float32) * 0.05
    wbk = jax.random.normal(k4, (L, H), dtype=jnp.float32) * 0.05
    wav = jax.random.normal(k5, (C, L), dtype=jnp.float32) * 0.05
    wbv = jax.random.normal(k6, (L, H), dtype=jnp.float32) * 0.05

    # RoPE buffers (same construction as the PyTorch RoPE module)
    inv_freq = 1.0 / (10000.0 ** (jnp.arange(0, H, 2, dtype=jnp.float32) / H))
    position = jnp.arange(0, block_size, dtype=jnp.float32)
    sinusoidal = position[:, None] * inv_freq[None, :]        # (block_size, H//2)
    cos_emb = jnp.cos(sinusoidal)[:T]                         # (T, H//2)
    sin_emb = jnp.sin(sinusoidal)[:T]

    # tkv=8 -> 2 kv tiles per batch element: exercises the online-softmax path
    out = latent_head(x, wq, bq, wak, wbk, wav, wbv, cos_emb, sin_emb, tkv=8)
    out = jax.block_until_ready(out)

    ref = reference(x, wq, bq, wak, wbk, wav, wbv, cos_emb, sin_emb)
    assert out.shape == (B, T, H)
    # bf16 MXU operands + approximate reciprocal => loosened tolerance vs f32 ref.
    assert jnp.allclose(out, ref, atol=2e-2, rtol=2e-2), "mismatch vs. reference"

    print("KERNEL_OK")
</pallas_src>

<mosaic_0001>
module attributes {stable_mosaic.version = 11 : i64} {
  func.func @latent_head_kernel(%arg0: i32, %arg1: i32, %arg2: memref<16x33xf32, #tpu.memory_space<vmem>>, %arg3: memref<33x256xbf16, #tpu.memory_space<vmem>>, %arg4: memref<33x128xbf16, #tpu.memory_space<vmem>>, %arg5: memref<128x384xbf16, #tpu.memory_space<vmem>>, %arg6: memref<16x128xf32, #tpu.memory_space<vmem>>, %arg7: memref<16x128xf32, #tpu.memory_space<vmem>>, %arg8: memref<16x128xf32, #tpu.memory_space<vmem>>, %arg9: memref<16x128xbf16, #tpu.memory_space<vmem>>, %arg10: memref<16x1xf32, #tpu.memory_space<vmem>>, %arg11: memref<16x1xf32, #tpu.memory_space<vmem>>, %arg12: memref<16x128xf32, #tpu.memory_space<vmem>>) attributes {dimension_semantics = [#tpu.dimension_semantics<parallel>, #tpu.dimension_semantics<arbitrary>], iteration_bounds = array<i64: 2, 2>, scalar_prefetch = 0 : i64, scratch_operands = 4 : i64, tpu.core_type = #tpu.core_type<tc>, window_params = [{transform_indices = @transform_0, window_bounds = array<i64: 16, 33>}, {pipeline_mode = #tpu.pipeline_mode<synchronous>, transform_indices = @transform_1, window_bounds = array<i64: 33, 256>}, {pipeline_mode = #tpu.pipeline_mode<synchronous>, transform_indices = @transform_2, window_bounds = array<i64: 33, 128>}, {pipeline_mode = #tpu.pipeline_mode<synchronous>, transform_indices = @transform_3, window_bounds = array<i64: 128, 384>}, {pipeline_mode = #tpu.pipeline_mode<synchronous>, transform_indices = @transform_4, window_bounds = array<i64: 16, 128>}, {pipeline_mode = #tpu.pipeline_mode<synchronous>, transform_indices = @transform_5, window_bounds = array<i64: 16, 128>}, {transform_indices = @transform_6, window_bounds = array<i64: 16, 128>}]} {
    %c0_i32 = arith.constant 0 : i32
    %0 = arith.cmpi eq, %arg1, %c0_i32 : i32
    %1 = arith.extui %0 : i1 to i32
    %c0_i32_0 = arith.constant 0 : i32
    %2 = arith.cmpi ne, %1, %c0_i32_0 : i32
    scf.if %2 {
      %c0_27 = arith.constant 0 : index
      %c0_28 = arith.constant 0 : index
      %53 = vector.load %arg2[%c0_27, %c0_28] : memref<16x33xf32, #tpu.memory_space<vmem>>, vector<16x33xf32>
      %54 = arith.truncf %53 : vector<16x33xf32> to vector<16x33xbf16>
      %c0_29 = arith.constant 0 : index
      %c0_30 = arith.constant 0 : index
      %55 = vector.load %arg3[%c0_29, %c0_30] : memref<33x256xbf16, #tpu.memory_space<vmem>>, vector<33x256xbf16>
      %cst_31 = arith.constant dense<0.000000e+00> : vector<16x256xf32>
      %56 = tpu.matmul %54, %55, %cst_31 {dimension_numbers = #tpu.dot_dimension_numbers<[1], [0], [0], [1], [0, 0, 1, 1], [], []>} : vector<16x33xbf16>, vector<33x256xbf16>, vector<16x256xf32> -> vector<16x256xf32>
      %57 = vector.extract_strided_slice %56 {offsets = [0, 0], sizes = [16, 128], strides = [1, 1]} : vector<16x256xf32> to vector<16x128xf32>
      %58 = vector.extract_strided_slice %56 {offsets = [0, 128], sizes = [16, 128], strides = [1, 1]} : vector<16x256xf32> to vector<16x128xf32>
      %c0_32 = arith.constant 0 : index
      %c0_33 = arith.constant 0 : index
      %59 = vector.load %arg6[%c0_32, %c0_33] : memref<16x128xf32, #tpu.memory_space<vmem>>, vector<16x128xf32>
      %60 = arith.mulf %57, %59 : vector<16x128xf32>
      %c0_34 = arith.constant 0 : index
      %c0_35 = arith.constant 0 : index
      %61 = vector.load %arg7[%c0_34, %c0_35] : memref<16x128xf32, #tpu.memory_space<vmem>>, vector<16x128xf32>
      %62 = arith.mulf %58, %61 : vector<16x128xf32>
      %63 = arith.addf %60, %62 : vector<16x128xf32>
      %64 = arith.truncf %63 : vector<16x128xf32> to vector<16x128xbf16>
      %c0_36 = arith.constant 0 : index
      %c0_37 = arith.constant 0 : index
      %65 = vector.load %arg9[%c0_36, %c0_37] : memref<16x128xbf16, #tpu.memory_space<vmem>>, vector<16x128xbf16>
      tpu.vector_store %arg9[%c0_36, %c0_37], %64 {strides = array<i32>} : memref<16x128xbf16, #tpu.memory_space<vmem>>, vector<16x128xbf16>,
      %cst_38 = arith.constant 0xFF800000 : f32
      %66 = vector.broadcast %cst_38 : f32 to vector<16x1xf32>
      %c0_39 = arith.constant 0 : index
      %c0_40 = arith.constant 0 : index
      %67 = vector.load %arg10[%c0_39, %c0_40] : memref<16x1xf32, #tpu.memory_space<vmem>>, vector<16x1xf32>
      tpu.vector_store %arg10[%c0_39, %c0_40], %66 {strides = array<i32>} : memref<16x1xf32, #tpu.memory_space<vmem>>, vector<16x1xf32>,
      %cst_41 = arith.constant 0.000000e+00 : f32
      %68 = vector.broadcast %cst_41 : f32 to vector<16x1xf32>
      %c0_42 = arith.constant 0 : index
      %c0_43 = arith.constant 0 : index
      %69 = vector.load %arg11[%c0_42, %c0_43] : memref<16x1xf32, #tpu.memory_space<vmem>>, vector<16x1xf32>
      tpu.vector_store %arg11[%c0_42, %c0_43], %68 {strides = array<i32>} : memref<16x1xf32, #tpu.memory_space<vmem>>, vector<16x1xf32>,
      %cst_44 = arith.constant 0.000000e+00 : f32
      %70 = vector.broadcast %cst_44 : f32 to vector<16x128xf32>
      %c0_45 = arith.constant 0 : index
      %c0_46 = arith.constant 0 : index
      %71 = vector.load %arg12[%c0_45, %c0_46] : memref<16x128xf32, #tpu.memory_space<vmem>>, vector<16x128xf32>
      tpu.vector_store %arg12[%c0_45, %c0_46], %70 {strides = array<i32>} : memref<16x128xf32, #tpu.memory_space<vmem>>, vector<16x128xf32>,
    } else {
    }
    %c8_i32 = arith.constant 8 : i32
    %3 = arith.muli %arg1, %c8_i32 : i32
    %4 = tpu.assume_multiple %3, 8 : i32
    %5 = arith.index_cast %4 : i32 to index
    %c0 = arith.constant 0 : index
    %6 = vector.load %arg2[%5, %c0] : memref<16x33xf32, #tpu.memory_space<vmem>>, vector<8x33xf32>
    %7 = arith.index_cast %4 : i32 to index
    %c0_1 = arith.constant 0 : index
    %8 = vector.load %arg6[%7, %c0_1] : memref<16x128xf32, #tpu.memory_space<vmem>>, vector<8x128xf32>
    %9 = arith.index_cast %4 : i32 to index
    %c0_2 = arith.constant 0 : index
    %10 = vector.load %arg7[%9, %c0_2] : memref<16x128xf32, #tpu.memory_space<vmem>>, vector<8x128xf32>
    %11 = arith.truncf %6 : vector<8x33xf32> to vector<8x33xbf16>
    %c0_3 = arith.constant 0 : index
    %c0_4 = arith.constant 0 : index
    %12 = vector.load %arg4[%c0_3, %c0_4] : memref<33x128xbf16, #tpu.memory_space<vmem>>, vector<33x128xbf16>
    %cst = arith.constant dense<0.000000e+00> : vector<8x128xf32>
    %13 = tpu.matmul %11, %12, %cst {dimension_numbers = #tpu.dot_dimension_numbers<[1], [0], [0], [1], [0, 0, 1, 1], [], []>} : vector<8x33xbf16>, vector<33x128xbf16>, vector<8x128xf32> -> vector<8x128xf32>
    %14 = arith.truncf %13 : vector<8x128xf32> to vector<8x128xbf16>
    %c0_5 = arith.constant 0 : index
    %c0_6 = arith.constant 0 : index
    %15 = vector.load %arg5[%c0_5, %c0_6] : memref<128x384xbf16, #tpu.memory_space<vmem>>, vector<128x384xbf16>
    %cst_7 = arith.constant dense<0.000000e+00> : vector<8x384xf32>
    %16 = tpu.matmul %14, %15, %cst_7 {dimension_numbers = #tpu.dot_dimension_numbers<[1], [0], [0], [1], [0, 0, 1, 1], [], []>} : vector<8x128xbf16>, vector<128x384xbf16>, vector<8x384xf32> -> vector<8x384xf32>
    %17 = vector.extract_strided_slice %16 {offsets = [0, 0], sizes = [8, 128], strides = [1, 1]} : vector<8x384xf32> to vector<8x128xf32>
    %18 = vector.extract_strided_slice %16 {offsets = [0, 128], sizes = [8, 128], strides = [1, 1]} : vector<8x384xf32> to vector<8x128xf32>
    %19 = vector.extract_strided_slice %16 {offsets = [0, 256], sizes = [8, 128], strides = [1, 1]} : vector<8x384xf32> to vector<8x128xf32>
    %20 = arith.mulf %17, %8 : vector<8x128xf32>
    %21 = arith.mulf %18, %10 : vector<8x128xf32>
    %22 = arith.addf %20, %21 : vector<8x128xf32>
    %23 = arith.truncf %22 : vector<8x128xf32> to vector<8x128xbf16>
    %c0_8 = arith.constant 0 : index
    %c0_9 = arith.constant 0 : index
    %24 = vector.load %arg9[%c0_8, %c0_9] : memref<16x128xbf16, #tpu.memory_space<vmem>>, vector<16x128xbf16>
    %cst_10 = arith.constant dense<0.000000e+00> : vector<16x8xf32>
    %25 = tpu.matmul %24, %23, %cst_10 {dimension_numbers = #tpu.dot_dimension_numbers<[1], [1], [0], [0], [0, 0, 1, 0], [], []>} : vector<16x128xbf16>, vector<8x128xbf16>, vector<16x8xf32> -> vector<16x8xf32>
    %c0_11 = arith.constant 0 : index
    %c0_12 = arith.constant 0 : index
    %26 = vector.load %arg10[%c0_11, %c0_12] : memref<16x1xf32, #tpu.memory_space<vmem>>, vector<16x1xf32>
    %cst_13 = arith.constant dense<0xFF800000> : vector<16xf32>
    %27 = vector.multi_reduction <maximumf>, %25, %cst_13 [1] : vector<16x8xf32> to vector<16xf32>
    %28 = vector.shape_cast %27 : vector<16xf32> to vector<16x1xf32>
    %29 = arith.maximumf %26, %28 : vector<16x1xf32>
    %30 = arith.subf %26, %29 : vector<16x1xf32>
    %31 = math.exp %30 : vector<16x1xf32>
    %32 = vector.broadcast %29 : vector<16x1xf32> to vector<16x8xf32>
    %33 = arith.subf %25, %32 : vector<16x8xf32>
    %34 = math.exp %33 : vector<16x8xf32>
    %c0_14 = arith.constant 0 : index
    %c0_15 = arith.constant 0 : index
    %35 = vector.load %arg11[%c0_14, %c0_15] : memref<16x1xf32, #tpu.memory_space<vmem>>, vector<16x1xf32>
    %36 = arith.mulf %31, %35 : vector<16x1xf32>
    %cst_16 = arith.constant dense<0.000000e+00> : vector<16xf32>
    %37 = vector.multi_reduction <add>, %34, %cst_16 [1] : vector<16x8xf32> to vector<16xf32>
    %38 = vector.shape_cast %37 : vector<16xf32> to vector<16x1xf32>
    %39 = arith.addf %36, %38 : vector<16x1xf32>
    %c0_17 = arith.constant 0 : index
    %c0_18 = arith.constant 0 : index
    %40 = vector.load %arg11[%c0_17, %c0_18] : memref<16x1xf32, #tpu.memory_space<vmem>>, vector<16x1xf32>
    tpu.vector_store %arg11[%c0_17, %c0_18], %39 {strides = array<i32>} : memref<16x1xf32, #tpu.memory_space<vmem>>, vector<16x1xf32>,
    %c0_19 = arith.constant 0 : index
    %c0_20 = arith.constant 0 : index
    %41 = vector.load %arg12[%c0_19, %c0_20] : memref<16x128xf32, #tpu.memory_space<vmem>>, vector<16x128xf32>
    %42 = vector.broadcast %31 : vector<16x1xf32> to vector<16x128xf32>
    %43 = arith.mulf %42, %41 : vector<16x128xf32>
    %44 = arith.truncf %34 : vector<16x8xf32> to vector<16x8xbf16>
    %45 = arith.truncf %19 : vector<8x128xf32> to vector<8x128xbf16>
    %cst_21 = arith.constant dense<0.000000e+00> : vector<16x128xf32>
    %46 = tpu.matmul %44, %45, %cst_21 {dimension_numbers = #tpu.dot_dimension_numbers<[1], [0], [0], [1], [0, 0, 1, 1], [], []>} : vector<16x8xbf16>, vector<8x128xbf16>, vector<16x128xf32> -> vector<16x128xf32>
    %47 = arith.addf %43, %46 : vector<16x128xf32>
    %c0_22 = arith.constant 0 : index
    %c0_23 = arith.constant 0 : index
    %48 = vector.load %arg12[%c0_22, %c0_23] : memref<16x128xf32, #tpu.memory_space<vmem>>, vector<16x128xf32>
    tpu.vector_store %arg12[%c0_22, %c0_23], %47 {strides = array<i32>} : memref<16x128xf32, #tpu.memory_space<vmem>>, vector<16x128xf32>,
    %c0_24 = arith.constant 0 : index
    %c0_25 = arith.constant 0 : index
    %49 = vector.load %arg10[%c0_24, %c0_25] : memref<16x1xf32, #tpu.memory_space<vmem>>, vector<16x1xf32>
    tpu.vector_store %arg10[%c0_24, %c0_25], %29 {strides = array<i32>} : memref<16x1xf32, #tpu.memory_space<vmem>>, vector<16x1xf32>,
    %c1_i32 = arith.constant 1 : i32
    %50 = arith.cmpi eq, %arg1, %c1_i32 : i32
    %51 = arith.extui %50 : i1 to i32
    %c0_i32_26 = arith.constant 0 : i32
    %52 = arith.cmpi ne, %51, %c0_i32_26 : i32
    scf.if %52 {
      %c0_27 = arith.constant 0 : index
      %c0_28 = arith.constant 0 : index
      %53 = vector.load %arg12[%c0_27, %c0_28] : memref<16x128xf32, #tpu.memory_space<vmem>>, vector<16x128xf32>
      %c0_29 = arith.constant 0 : index
      %c0_30 = arith.constant 0 : index
      %54 = vector.load %arg11[%c0_29, %c0_30] : memref<16x1xf32, #tpu.memory_space<vmem>>, vector<16x1xf32>
      %55 = tpu.reciprocal %54 {approx = true} : vector<16x1xf32> -> vector<16x1xf32>
      %56 = vector.broadcast %55 : vector<16x1xf32> to vector<16x128xf32>
      %57 = arith.mulf %53, %56 : vector<16x128xf32>
      %c0_31 = arith.constant 0 : index
      %c0_32 = arith.constant 0 : index
      %58 = vector.load %arg8[%c0_31, %c0_32] : memref<16x128xf32, #tpu.memory_space<vmem>>, vector<16x128xf32>
      tpu.vector_store %arg8[%c0_31, %c0_32], %57 {strides = array<i32>} : memref<16x128xf32, #tpu.memory_space<vmem>>, vector<16x128xf32>,
    } else {
    }
    return
  }
  func.func @transform_0(%arg0: i32, %arg1: i32) -> (i32, i32) {
    %c0_i32 = arith.constant 0 : i32
    %c0_i32_0 = arith.constant 0 : i32
    return %arg0, %c0_i32 : i32, i32
  }
  func.func @transform_1(%arg0: i32, %arg1: i32) -> (i32, i32) {
    %c0_i32 = arith.constant 0 : i32
    %c0_i32_0 = arith.constant 0 : i32
    %c0_i32_1 = arith.constant 0 : i32
    return %c0_i32, %c0_i32_0 : i32, i32
  }
  func.func @transform_2(%arg0: i32, %arg1: i32) -> (i32, i32) {
    %c0_i32 = arith.constant 0 : i32
    %c0_i32_0 = arith.constant 0 : i32
    %c0_i32_1 = arith.constant 0 : i32
    return %c0_i32, %c0_i32_0 : i32, i32
  }
  func.func @transform_3(%arg0: i32, %arg1: i32) -> (i32, i32) {
    %c0_i32 = arith.constant 0 : i32
    %c0_i32_0 = arith.constant 0 : i32
    %c0_i32_1 = arith.constant 0 : i32
    return %c0_i32, %c0_i32_0 : i32, i32
  }
  func.func @transform_4(%arg0: i32, %arg1: i32) -> (i32, i32) {
    %c0_i32 = arith.constant 0 : i32
    %c0_i32_0 = arith.constant 0 : i32
    %c0_i32_1 = arith.constant 0 : i32
    return %c0_i32, %c0_i32_0 : i32, i32
  }
  func.func @transform_5(%arg0: i32, %arg1: i32) -> (i32, i32) {
    %c0_i32 = arith.constant 0 : i32
    %c0_i32_0 = arith.constant 0 : i32
    %c0_i32_1 = arith.constant 0 : i32
    return %c0_i32, %c0_i32_0 : i32, i32
  }
  func.func @transform_6(%arg0: i32, %arg1: i32) -> (i32, i32) {
    %c0_i32 = arith.constant 0 : i32
    %c0_i32_0 = arith.constant 0 : i32
    return %arg0, %c0_i32 : i32, i32
  }
}

module attributes {stable_mosaic.version = 11 : i64} {
  func.func @latent_head_kernel(%arg0: i32, %arg1: i32, %arg2: memref<16x33xf32, #tpu.memory_space<vmem>>, %arg3: memref<33x256xbf16, #tpu.memory_space<vmem>>, %arg4: memref<33x128xbf16, #tpu.memory_space<vmem>>, %arg5: memref<128x384xbf16, #tpu.memory_space<vmem>>, %arg6: memref<16x128xf32, #tpu.memory_space<vmem>>, %arg7: memref<16x128xf32, #tpu.memory_space<vmem>>, %arg8: memref<16x128xf32, #tpu.memory_space<vmem>>, %arg9: memref<16x128xbf16, #tpu.memory_space<vmem>>, %arg10: memref<16x1xf32, #tpu.memory_space<vmem>>, %arg11: memref<16x1xf32, #tpu.memory_space<vmem>>, %arg12: memref<16x128xf32, #tpu.memory_space<vmem>>) attributes {dimension_semantics = [#tpu.dimension_semantics<parallel>, #tpu.dimension_semantics<arbitrary>], iteration_bounds = array<i64: 2, 2>, scalar_prefetch = 0 : i64, scratch_operands = 4 : i64, tpu.core_type = #tpu.core_type<tc>, window_params = [{transform_indices = @transform_0, window_bounds = array<i64: 16, 33>}, {pipeline_mode = #tpu.pipeline_mode<synchronous>, transform_indices = @transform_1, window_bounds = array<i64: 33, 256>}, {pipeline_mode = #tpu.pipeline_mode<synchronous>, transform_indices = @transform_2, window_bounds = array<i64: 33, 128>}, {pipeline_mode = #tpu.pipeline_mode<synchronous>, transform_indices = @transform_3, window_bounds = array<i64: 128, 384>}, {pipeline_mode = #tpu.pipeline_mode<synchronous>, transform_indices = @transform_4, window_bounds = array<i64: 16, 128>}, {pipeline_mode = #tpu.pipeline_mode<synchronous>, transform_indices = @transform_5, window_bounds = array<i64: 16, 128>}, {transform_indices = @transform_6, window_bounds = array<i64: 16, 128>}]} {
    %c0_i32 = arith.constant 0 : i32
    %0 = arith.cmpi eq, %arg1, %c0_i32 : i32
    %1 = arith.extui %0 : i1 to i32
    %c0_i32_0 = arith.constant 0 : i32
    %2 = arith.cmpi ne, %1, %c0_i32_0 : i32
    scf.if %2 {
      %c0_27 = arith.constant 0 : index
      %c0_28 = arith.constant 0 : index
      %53 = vector.load %arg2[%c0_27, %c0_28] : memref<16x33xf32, #tpu.memory_space<vmem>>, vector<16x33xf32>
      %54 = arith.truncf %53 : vector<16x33xf32> to vector<16x33xbf16>
      %c0_29 = arith.constant 0 : index
      %c0_30 = arith.constant 0 : index
      %55 = vector.load %arg3[%c0_29, %c0_30] : memref<33x256xbf16, #tpu.memory_space<vmem>>, vector<33x256xbf16>
      %cst_31 = arith.constant dense<0.000000e+00> : vector<16x256xf32>
      %56 = tpu.matmul %54, %55, %cst_31 {dimension_numbers = #tpu.dot_dimension_numbers<[1], [0], [0], [1], [0, 0, 1, 1], [], []>} : vector<16x33xbf16>, vector<33x256xbf16>, vector<16x256xf32> -> vector<16x256xf32>
      %57 = vector.extract_strided_slice %56 {offsets = [0, 0], sizes = [16, 128], strides = [1, 1]} : vector<16x256xf32> to vector<16x128xf32>
      %58 = vector.extract_strided_slice %56 {offsets = [0, 128], sizes = [16, 128], strides = [1, 1]} : vector<16x256xf32> to vector<16x128xf32>
      %c0_32 = arith.constant 0 : index
      %c0_33 = arith.constant 0 : index
      %59 = vector.load %arg6[%c0_32, %c0_33] : memref<16x128xf32, #tpu.memory_space<vmem>>, vector<16x128xf32>
      %60 = arith.mulf %57, %59 : vector<16x128xf32>
      %c0_34 = arith.constant 0 : index
      %c0_35 = arith.constant 0 : index
      %61 = vector.load %arg7[%c0_34, %c0_35] : memref<16x128xf32, #tpu.memory_space<vmem>>, vector<16x128xf32>
      %62 = arith.mulf %58, %61 : vector<16x128xf32>
      %63 = arith.addf %60, %62 : vector<16x128xf32>
      %64 = arith.truncf %63 : vector<16x128xf32> to vector<16x128xbf16>
      %c0_36 = arith.constant 0 : index
      %c0_37 = arith.constant 0 : index
      %65 = vector.load %arg9[%c0_36, %c0_37] : memref<16x128xbf16, #tpu.memory_space<vmem>>, vector<16x128xbf16>
      tpu.vector_store %arg9[%c0_36, %c0_37], %64 {strides = array<i32>} : memref<16x128xbf16, #tpu.memory_space<vmem>>, vector<16x128xbf16>,
      %cst_38 = arith.constant 0xFF800000 : f32
      %66 = vector.broadcast %cst_38 : f32 to vector<16x1xf32>
      %c0_39 = arith.constant 0 : index
      %c0_40 = arith.constant 0 : index
      %67 = vector.load %arg10[%c0_39, %c0_40] : memref<16x1xf32, #tpu.memory_space<vmem>>, vector<16x1xf32>
      tpu.vector_store %arg10[%c0_39, %c0_40], %66 {strides = array<i32>} : memref<16x1xf32, #tpu.memory_space<vmem>>, vector<16x1xf32>,
      %cst_41 = arith.constant 0.000000e+00 : f32
      %68 = vector.broadcast %cst_41 : f32 to vector<16x1xf32>
      %c0_42 = arith.constant 0 : index
      %c0_43 = arith.constant 0 : index
      %69 = vector.load %arg11[%c0_42, %c0_43] : memref<16x1xf32, #tpu.memory_space<vmem>>, vector<16x1xf32>
      tpu.vector_store %arg11[%c0_42, %c0_43], %68 {strides = array<i32>} : memref<16x1xf32, #tpu.memory_space<vmem>>, vector<16x1xf32>,
      %cst_44 = arith.constant 0.000000e+00 : f32
      %70 = vector.broadcast %cst_44 : f32 to vector<16x128xf32>
      %c0_45 = arith.constant 0 : index
      %c0_46 = arith.constant 0 : index
      %71 = vector.load %arg12[%c0_45, %c0_46] : memref<16x128xf32, #tpu.memory_space<vmem>>, vector<16x128xf32>
      tpu.vector_store %arg12[%c0_45, %c0_46], %70 {strides = array<i32>} : memref<16x128xf32, #tpu.memory_space<vmem>>, vector<16x128xf32>,
    } else {
    }
    %c8_i32 = arith.constant 8 : i32
    %3 = arith.muli %arg1, %c8_i32 : i32
    %4 = tpu.assume_multiple %3, 8 : i32
    %5 = arith.index_cast %4 : i32 to index
    %c0 = arith.constant 0 : index
    %6 = vector.load %arg2[%5, %c0] : memref<16x33xf32, #tpu.memory_space<vmem>>, vector<8x33xf32>
    %7 = arith.index_cast %4 : i32 to index
    %c0_1 = arith.constant 0 : index
    %8 = vector.load %arg6[%7, %c0_1] : memref<16x128xf32, #tpu.memory_space<vmem>>, vector<8x128xf32>
    %9 = arith.index_cast %4 : i32 to index
    %c0_2 = arith.constant 0 : index
    %10 = vector.load %arg7[%9, %c0_2] : memref<16x128xf32, #tpu.memory_space<vmem>>, vector<8x128xf32>
    %11 = arith.truncf %6 : vector<8x33xf32> to vector<8x33xbf16>
    %c0_3 = arith.constant 0 : index
    %c0_4 = arith.constant 0 : index
    %12 = vector.load %arg4[%c0_3, %c0_4] : memref<33x128xbf16, #tpu.memory_space<vmem>>, vector<33x128xbf16>
    %cst = arith.constant dense<0.000000e+00> : vector<8x128xf32>
    %13 = tpu.matmul %11, %12, %cst {dimension_numbers = #tpu.dot_dimension_numbers<[1], [0], [0], [1], [0, 0, 1, 1], [], []>} : vector<8x33xbf16>, vector<33x128xbf16>, vector<8x128xf32> -> vector<8x128xf32>
    %14 = arith.truncf %13 : vector<8x128xf32> to vector<8x128xbf16>
    %c0_5 = arith.constant 0 : index
    %c0_6 = arith.constant 0 : index
    %15 = vector.load %arg5[%c0_5, %c0_6] : memref<128x384xbf16, #tpu.memory_space<vmem>>, vector<128x384xbf16>
    %cst_7 = arith.constant dense<0.000000e+00> : vector<8x384xf32>
    %16 = tpu.matmul %14, %15, %cst_7 {dimension_numbers = #tpu.dot_dimension_numbers<[1], [0], [0], [1], [0, 0, 1, 1], [], []>} : vector<8x128xbf16>, vector<128x384xbf16>, vector<8x384xf32> -> vector<8x384xf32>
    %17 = vector.extract_strided_slice %16 {offsets = [0, 0], sizes = [8, 128], strides = [1, 1]} : vector<8x384xf32> to vector<8x128xf32>
    %18 = vector.extract_strided_slice %16 {offsets = [0, 128], sizes = [8, 128], strides = [1, 1]} : vector<8x384xf32> to vector<8x128xf32>
    %19 = vector.extract_strided_slice %16 {offsets = [0, 256], sizes = [8, 128], strides = [1, 1]} : vector<8x384xf32> to vector<8x128xf32>
    %20 = arith.mulf %17, %8 : vector<8x128xf32>
    %21 = arith.mulf %18, %10 : vector<8x128xf32>
    %22 = arith.addf %20, %21 : vector<8x128xf32>
    %23 = arith.truncf %22 : vector<8x128xf32> to vector<8x128xbf16>
    %c0_8 = arith.constant 0 : index
    %c0_9 = arith.constant 0 : index
    %24 = vector.load %arg9[%c0_8, %c0_9] : memref<16x128xbf16, #tpu.memory_space<vmem>>, vector<16x128xbf16>
    %cst_10 = arith.constant dense<0.000000e+00> : vector<16x8xf32>
    %25 = tpu.matmul %24, %23, %cst_10 {dimension_numbers = #tpu.dot_dimension_numbers<[1], [1], [0], [0], [0, 0, 1, 0], [], []>} : vector<16x128xbf16>, vector<8x128xbf16>, vector<16x8xf32> -> vector<16x8xf32>
    %c0_11 = arith.constant 0 : index
    %c0_12 = arith.constant 0 : index
    %26 = vector.load %arg10[%c0_11, %c0_12] : memref<16x1xf32, #tpu.memory_space<vmem>>, vector<16x1xf32>
    %cst_13 = arith.constant dense<0xFF800000> : vector<16xf32>
    %27 = vector.multi_reduction <maximumf>, %25, %cst_13 [1] : vector<16x8xf32> to vector<16xf32>
    %28 = vector.shape_cast %27 : vector<16xf32> to vector<16x1xf32>
    %29 = arith.maximumf %26, %28 : vector<16x1xf32>
    %30 = arith.subf %26, %29 : vector<16x1xf32>
    %31 = math.exp %30 : vector<16x1xf32>
    %32 = vector.broadcast %29 : vector<16x1xf32> to vector<16x8xf32>
    %33 = arith.subf %25, %32 : vector<16x8xf32>
    %34 = math.exp %33 : vector<16x8xf32>
    %c0_14 = arith.constant 0 : index
    %c0_15 = arith.constant 0 : index
    %35 = vector.load %arg11[%c0_14, %c0_15] : memref<16x1xf32, #tpu.memory_space<vmem>>, vector<16x1xf32>
    %36 = arith.mulf %31, %35 : vector<16x1xf32>
    %cst_16 = arith.constant dense<0.000000e+00> : vector<16xf32>
    %37 = vector.multi_reduction <add>, %34, %cst_16 [1] : vector<16x8xf32> to vector<16xf32>
    %38 = vector.shape_cast %37 : vector<16xf32> to vector<16x1xf32>
    %39 = arith.addf %36, %38 : vector<16x1xf32>
    %c0_17 = arith.constant 0 : index
    %c0_18 = arith.constant 0 : index
    %40 = vector.load %arg11[%c0_17, %c0_18] : memref<16x1xf32, #tpu.memory_space<vmem>>, vector<16x1xf32>
    tpu.vector_store %arg11[%c0_17, %c0_18], %39 {strides = array<i32>} : memref<16x1xf32, #tpu.memory_space<vmem>>, vector<16x1xf32>,
    %c0_19 = arith.constant 0 : index
    %c0_20 = arith.constant 0 : index
    %41 = vector.load %arg12[%c0_19, %c0_20] : memref<16x128xf32, #tpu.memory_space<vmem>>, vector<16x128xf32>
    %42 = vector.broadcast %31 : vector<16x1xf32> to vector<16x128xf32>
    %43 = arith.mulf %42, %41 : vector<16x128xf32>
    %44 = arith.truncf %34 : vector<16x8xf32> to vector<16x8xbf16>
    %45 = arith.truncf %19 : vector<8x128xf32> to vector<8x128xbf16>
    %cst_21 = arith.constant dense<0.000000e+00> : vector<16x128xf32>
    %46 = tpu.matmul %44, %45, %cst_21 {dimension_numbers = #tpu.dot_dimension_numbers<[1], [0], [0], [1], [0, 0, 1, 1], [], []>} : vector<16x8xbf16>, vector<8x128xbf16>, vector<16x128xf32> -> vector<16x128xf32>
    %47 = arith.addf %43, %46 : vector<16x128xf32>
    %c0_22 = arith.constant 0 : index
    %c0_23 = arith.constant 0 : index
    %48 = vector.load %arg12[%c0_22, %c0_23] : memref<16x128xf32, #tpu.memory_space<vmem>>, vector<16x128xf32>
    tpu.vector_store %arg12[%c0_22, %c0_23], %47 {strides = array<i32>} : memref<16x128xf32, #tpu.memory_space<vmem>>, vector<16x128xf32>,
    %c0_24 = arith.constant 0 : index
    %c0_25 = arith.constant 0 : index
    %49 = vector.load %arg10[%c0_24, %c0_25] : memref<16x1xf32, #tpu.memory_space<vmem>>, vector<16x1xf32>
    tpu.vector_store %arg10[%c0_24, %c0_25], %29 {strides = array<i32>} : memref<16x1xf32, #tpu.memory_space<vmem>>, vector<16x1xf32>,
    %c1_i32 = arith.constant 1 : i32
    %50 = arith.cmpi eq, %arg1, %c1_i32 : i32
    %51 = arith.extui %50 : i1 to i32
    %c0_i32_26 = arith.constant 0 : i32
    %52 = arith.cmpi ne, %51, %c0_i32_26 : i32
    scf.if %52 {
      %c0_27 = arith.constant 0 : index
      %c0_28 = arith.constant 0 : index
      %53 = vector.load %arg12[%c0_27, %c0_28] : memref<16x128xf32, #tpu.memory_space<vmem>>, vector<16x128xf32>
      %c0_29 = arith.constant 0 : index
      %c0_30 = arith.constant 0 : index
      %54 = vector.load %arg11[%c0_29, %c0_30] : memref<16x1xf32, #tpu.memory_space<vmem>>, vector<16x1xf32>
      %55 = tpu.reciprocal %54 {approx = true} : vector<16x1xf32> -> vector<16x1xf32>
      %56 = vector.broadcast %55 : vector<16x1xf32> to vector<16x128xf32>
      %57 = arith.mulf %53, %56 : vector<16x128xf32>
      %c0_31 = arith.constant 0 : index
      %c0_32 = arith.constant 0 : index
      %58 = vector.load %arg8[%c0_31, %c0_32] : memref<16x128xf32, #tpu.memory_space<vmem>>, vector<16x128xf32>
      tpu.vector_store %arg8[%c0_31, %c0_32], %57 {strides = array<i32>} : memref<16x128xf32, #tpu.memory_space<vmem>>, vector<16x128xf32>,
    } else {
    }
    return
  }
  func.func @transform_0(%arg0: i32, %arg1: i32) -> (i32, i32) {
    %c0_i32 = arith.constant 0 : i32
    %c0_i32_0 = arith.constant 0 : i32
    return %arg0, %c0_i32 : i32, i32
  }
  func.func @transform_1(%arg0: i32, %arg1: i32) -> (i32, i32) {
    %c0_i32 = arith.constant 0 : i32
    %c0_i32_0 = arith.constant 0 : i32
    %c0_i32_1 = arith.constant 0 : i32
    return %c0_i32, %c0_i32_0 : i32, i32
  }
  func.func @transform_2(%arg0: i32, %arg1: i32) -> (i32, i32) {
    %c0_i32 = arith.constant 0 : i32
    %c0_i32_0 = arith.constant 0 : i32
    %c0_i32_1 = arith.constant 0 : i32
    return %c0_i32, %c0_i32_0 : i32, i32
  }
  func.func @transform_3(%arg0: i32, %arg1: i32) -> (i32, i32) {
    %c0_i32 = arith.constant 0 : i32
    %c0_i32_0 = arith.constant 0 : i32
    %c0_i32_1 = arith.constant 0 : i32
    return %c0_i32, %c0_i32_0 : i32, i32
  }
  func.func @transform_4(%arg0: i32, %arg1: i32) -> (i32, i32) {
    %c0_i32 = arith.constant 0 : i32
    %c0_i32_0 = arith.constant 0 : i32
    %c0_i32_1 = arith.constant 0 : i32
    return %c0_i32, %c0_i32_0 : i32, i32
  }
  func.func @transform_5(%arg0: i32, %arg1: i32) -> (i32, i32) {
    %c0_i32 = arith.constant 0 : i32
    %c0_i32_0 = arith.constant 0 : i32
    %c0_i32_1 = arith.constant 0 : i32
    return %c0_i32, %c0_i32_0 : i32, i32
  }
  func.func @transform_6(%arg0: i32, %arg1: i32) -> (i32, i32) {
    %c0_i32 = arith.constant 0 : i32
    %c0_i32_0 = arith.constant 0 : i32
    return %arg0, %c0_i32 : i32, i32
  }
}

</mosaic_0001>

<bundles_post_ra>
// kernel: tpu_custom_call.1
= control target key start
LH: loop header
LB: loop body
LE: loop exit
PB: predicated region body
PF: predicated region fallthrough
CT: control target
= control target key end

     0   :  { %s2107_s0 = inlined_call_operand.hbm [shape: f32[32,33], index: 0, kind: input, shape index: {}]   ;;  %s2108_s1 = inlined_call_operand.hbm [shape: bf16[33,256], index: 1, kind: input, shape index: {}]   ;;  %s2109_s2 = inlined_call_operand.hbm [shape: bf16[33,128], index: 2, kind: input, shape index: {}]   ;;  %s2110_s3 = inlined_call_operand.hbm [shape: bf16[128,384], index: 3, kind: input, shape index: {}]   ;;  %s2111_s4 = inlined_call_operand.hbm [shape: f32[16,128], index: 4, kind: input, shape index: {}]   ;;  %s2112_s5 = inlined_call_operand.hbm [shape: f32[16,128], index: 5, kind: input, shape index: {}]   ;;  %s2113_s6 = inlined_call_operand.hbm [shape: f32[32,128], index: 6, kind: output, shape index: {}]  }
   0x1   :  { %2120 = sst [smem:[#allocation25_spill]] %s2108_s1 }
   0x2   :  { %2121 = sst [smem:[#allocation26_spill]] %s2109_s2 }
   0x3   :  { %2122 = sst [smem:[#allocation27_spill]] %s2110_s3 }
   0x4   :  { %2123 = sst [smem:[#allocation28_spill]] %s2111_s4 }
   0x5   :  { %2124 = sst [smem:[#allocation29_spill]] %s2112_s5 }
   0x6   :  { %11 = vsyncpa [#allocation7], 0 }
   0x7   :  { %13 = vsyncpa [#allocation7 + $0x1], 0 }
   0x8   :  { %14 = vsyncpa [#allocation10], 0 }
   0x9   :  { %15 = vsyncpa [#allocation13], 0 }
   0xa   :  { %16 = vsyncpa [#allocation16], 0 }
   0xb   :  { %17 = vsyncpa [#allocation8], 0 }
   0xc   :  { %19 = vsyncpa [#allocation8 + $0x1], 0  ;;  %s1808_s21 = smov 0   ;;  %s1810_s22 = smov 0  }
   0xd   :  { %s1812_s23 = smov 0   ;;  %s1814_s24 = smov 0  }
   0xe   :  { %s1816_s25 = smov 0   ;;  %s1818_s26 = smov 0  }
   0xf   :  { %s1820_s27 = smov 0   ;;  %s1822_s28 = smov 0  }
  0x10 LB: > { %s2114_s29 = sadd.s32 4294967295, %s1749_s28   ;;  %p1147_p0 = scmp.ge.s32.totalorder %s1749_s28, 1  ;;  %s1749_s28 = sphi %s1822_s28, %s25_s28   ;;  %s1745_s27 = sphi %s1820_s27, %s2154_s27   ;;  %s1741_s26 = sphi %s1818_s26, %s2153_s26   ;;  %s1737_s25 = sphi %s1816_s25, %s2152_s25   ;;  %s1733_s24 = sphi %s1814_s24, %s2151_s24   ;;  %s1729_s23 = sphi %s1812_s23, %s2150_s23   ;;  %s1725_s22 = sphi %s1810_s22, %s2149_s22   ;;  %s1721_s21 = sphi %s1808_s21, %s2148_s21  }
  0x11   : > { %p1852_p1 = scmp.eq.s32.totalorder %s2114_s29, 0  ;;  %p199_p2 = scmp.lt.s32.totalorder %s1749_s28, 5 }
  0x12   : > { %s1751_s8 = smov [#allocation9]   ;;  %s1752_s11 = smov [#allocation12]  }
  0x13   : > { %p1857_p3 = pnand %p1147_p0, %p199_p2  ;;  %s211_s9 = sshll.u32 %s1751_s8, 4  ;;  %s212_s9 = int_to_ptr.vmem [resolvable:$true] %s211_s9 }
  0x14   : > { %s237_s12 = sshll.u32 %s1752_s11, 4  ;;  %s1494_s14 = scalar_lea.vmem %s212_s9, 640  ;;  %s238_s12 = int_to_ptr.vmem [resolvable:$true] %s237_s12 }
  0x15   : > { %p1304_p4 = pneg %p1857_p3  ;;  %p1495_p7 = scmp.ne.s32.totalorder %s212_s9, %s1494_s14 }
  0x16   : > { %p1502_p10 = scmp.lt.s32.totalorder %s212_s9, %s212_s9  ;;  %p1503_p11 = scmp.lt.s32.totalorder %s1494_s14, %s1494_s14 }
  0x17   : > { %p1865_p5 = pnand %p1304_p4, %p1852_p1 }
  0x18   : > { %p1504_p12 = por %p1503_p11, %p1502_p10 }
  0x19   : > { %p1871_p6 = pneg %p1865_p5 }
  0x1b   : > { %p1497_p8 = pnand %p1495_p7, %p1871_p6 }
  0x1d   : > { %p1498_p9 = pneg %p1497_p8 }
  0x1f   : > { %p1505_p13 = pnand %p1504_p12, %p1498_p9 }
  0x21   : > { %1508 = shalt.err (!%p1505_p13)
}
  0x22   : > { %s2115_s15 = smov 128   ;;  %s2117_s16 = smov 8  }
  0x23   : > { %s2129_s1 = sld [smem:[#allocation25_spill]]  ;;  %s1520_s19 = scalar_lea.vmem %s238_s12, 3072 }
  0x24   : > { %p1521_p0 = scmp.ne.s32.totalorder %s238_s12, %s1520_s19  ;;  %p1528_p7 = scmp.lt.s32.totalorder %s238_s12, %s238_s12 }
  0x25   : > { %p1529_p8 = scmp.lt.s32.totalorder %s1520_s19, %s1520_s19 }
  0x26   : > { %p1523_p2 = pnand %p1521_p0, %p1871_p6 }
  0x27   : > { %p1530_p9 = por %p1529_p8, %p1528_p7 }
  0x28   : > { %p1524_p4 = pneg %p1523_p2 }
  0x29   : > { %1307 = dma.hbm_to_vmem [thread:$0]  (!%p1865_p5), %s2129_s1, 640, %s212_s9, [#allocation10], %s2115_s15, %s2115_s15, %s2117_s16  }
  0x2a   : > { %p1531_p10 = pnand %p1530_p9, %p1524_p4 }
  0x2c   : > { %1534 = shalt.err (!%p1531_p10)
}
  0x2d   : > { %s1755_s20 = smov 192   ;;  %s1756_s8 = smov 12  }
  0x2e   : > { %s2130_s3 = sld [smem:[#allocation27_spill]]  ;;  %s1757_s9 = smov [#allocation11]  }
  0x2f   : > { %s224_s17 = sshll.u32 %s1757_s9, 4  ;;  %s225_s17 = int_to_ptr.vmem [resolvable:$true] %s224_s17 }
  0x30   : > { %s1546_s18 = scalar_lea.vmem %s225_s17, 320  ;;  %p1554_p0 = scmp.lt.s32.totalorder %s225_s17, %s225_s17 }
  0x31   : > { %p1547_p11 = scmp.ne.s32.totalorder %s225_s17, %s1546_s18  ;;  %p1555_p2 = scmp.lt.s32.totalorder %s1546_s18, %s1546_s18 }
  0x33   : > { %p1549_p12 = pnand %p1547_p11, %p1871_p6  ;;  %p1556_p4 = por %p1555_p2, %p1554_p0 }
  0x34   : > { %1313 = dma.hbm_to_vmem [thread:$0]  (!%p1865_p5), %s2130_s3, 3072, %s238_s12, [#allocation13], %s1755_s20, %s1755_s20, %s1756_s8  }
  0x35   : > { %p1550_p13 = pneg %p1549_p12 }
  0x37   : > { %p1557_p7 = pnand %p1556_p4, %p1550_p13 }
  0x39   : > { %1560 = shalt.err (!%p1557_p7)
}
  0x3a   : > { %s1758_s19 = smov 64   ;;  %s1759_s29 = smov 4  }
  0x3b   : > { %s2131_s2 = sld [smem:[#allocation26_spill]]  ;;  %s1760_s20 = smov [#allocation14]  }
  0x3c   : > { %s250_s8 = sshll.u32 %s1760_s20, 4  ;;  %s1761_s14 = smov [#allocation15]   ;;  %s251_s8 = int_to_ptr.vmem [resolvable:$true] %s250_s8 }
  0x3d   : > { %s263_s9 = sshll.u32 %s1761_s14, 4  ;;  %s1572_s15 = scalar_lea.vmem %s251_s8, 256  ;;  %s264_s9 = int_to_ptr.vmem [resolvable:$true] %s263_s9 }
  0x3e   : > { %p1573_p8 = scmp.ne.s32.totalorder %s251_s8, %s1572_s15  ;;  %p1580_p11 = scmp.lt.s32.totalorder %s251_s8, %s251_s8 }
  0x3f   : > { %p1581_p12 = scmp.lt.s32.totalorder %s1572_s15, %s1572_s15 }
  0x40   : > { %p1575_p9 = pnand %p1573_p8, %p1871_p6 }
  0x41   : > { %1310 = dma.hbm_to_vmem [thread:$0]  (!%p1865_p5), %s2131_s2, 320, %s225_s17, [#allocation10], %s1758_s19, %s1758_s19, %s1759_s29  }
  0x42   : > { %p1576_p10 = pneg %p1575_p9  ;;  %p1582_p13 = por %p1581_p12, %p1580_p11 }
  0x44   : > { %p1583_p0 = pnand %p1582_p13, %p1576_p10 }
  0x46   : > { %1586 = shalt.err (!%p1583_p0)
}
  0x47   : > { %s2132_s18 = smov 128   ;;  %s2133_s4 = sld [smem:[#allocation28_spill]] }
  0x48   : > { %s1598_s19 = scalar_lea.vmem %s264_s9, 256  ;;  %p1606_p8 = scmp.lt.s32.totalorder %s264_s9, %s264_s9 }
  0x49   : > { %p1599_p2 = scmp.ne.s32.totalorder %s264_s9, %s1598_s19  ;;  %p1607_p9 = scmp.lt.s32.totalorder %s1598_s19, %s1598_s19 }
  0x4b   : > { %p1601_p4 = pnand %p1599_p2, %p1871_p6  ;;  %p1608_p10 = por %p1607_p9, %p1606_p8 }
  0x4d   : > { %1316 = dma.hbm_to_vmem [thread:$0]  (!%p1865_p5), %s2133_s4, 256, %s251_s8, [#allocation13], %s2132_s18, %s2132_s18, %s2117_s16  }
  0x4e   : > { %p1602_p7 = pneg %p1601_p4 }
  0x50   : > { %p1609_p11 = pnand %p1608_p10, %p1602_p7 }
  0x52   : > { %1612 = shalt.err (!%p1609_p11)
}
  0x53   : > { %s2134_s5 = sld [smem:[#allocation29_spill]]  ;;  %s1146_s10 = sadd.s32 4294967294, %s1749_s28  }
  0x54   : > { %s34_s13 = sadd.s32 1, %s1741_s26  ;;  %s37_s12 = sadd.s32 1, %s1745_s27 }
  0x55   : > { %p35_p6 = scmp.ge.s32.totalorder %s34_s13, 2  ;;  %s44_s20 = sadd.s32 1, %s1729_s23 }
  0x56   : > { %p51_p12 = scmp.ne.s32.totalorder %s1729_s23, %s1725_s22  ;;  %p52_p13 = scmp.eq.s32.totalorder %s1749_s28, 0 }
  0x57   : > { %s2156_s13 = smov (%p35_p6, %s34_s13), 0  ;;  %s2158_s12 = smov (!%p35_p6, %s37_s12), %s1745_s27 }
  0x58   : > { %2135 = sst [smem:[#allocation23_spill]] %s2156_s13  ;;  %p1929_p0 = por %p52_p13, %p51_p12 }
  0x59   : > { %1319 = dma.hbm_to_vmem [thread:$0]  (!%p1865_p5), %s2134_s5, 256, %s264_s9, [#allocation16], %s2132_s18, %s2132_s18, %s2117_s16  }
  0x5a   : > { %p57_p5 = scmp.ne.s32.totalorder %s1725_s22, %s1721_s21  ;;  %p39_p2 = scmp.ge.s32.totalorder %s2158_s12, 2 }
  0x5b   : > { %s2137_s14 = sadd.s32 4294967295, %s1749_s28   ;;  %p192_p8 = scmp.eq.s32.totalorder %s1146_s10, 3 }
  0x5c   : > { %p186_p4 = scmp.eq.s32.totalorder %s2137_s14, 3  ;;  %p1939_p7 = por %p1852_p1, %p57_p5 }
  0x5d   : > { %s2160_s12 = smov (%p39_p2, %s2158_s12), 0  ;;  %p1949_p10 = por %p192_p8, %p57_p5 }
  0x5e   : > { %2139 = sst [smem:[#allocation24_spill]] %s2160_s12  ;;  %p1945_p9 = por %p186_p4, %p51_p12 }
  0x5f   : > { %s2141_s17 = scalar_select %p1949_p10, 1, 0 }
  0x60   : > { %s2140_s29 = scalar_select %p1945_p9, 1, 0 }
  0x61   : > { %s41_s19 = ssub.s32 %s1745_s27, %s2160_s12  ;;  %p1333_p11 = scmp.lt.s32.totalorder %s1749_s28, 4 }
  0x62   : > { %p42_p6 = scmp.eq.s32.totalorder %s41_s19, 0  ;;  %s277_s15 = sand.u32 1, %s1729_s23  }
  0x63   : > { %s1154_s11 = sshll.u32 %s277_s15, 4  ;;  %s1212_s16 = sshll.u32 %s1745_s27, 8 }
  0x64   : > { %s1958_s14 = scalar_select %p42_p6, %s1729_s23, %s44_s20  }
  0x65   : > { %s287_s2 = scalar_lea.hbm %s2107_s0, %s1212_s16  ;;  %s281_s3 = scalar_lea.vmem [#allocation6], %s1154_s11 }
  0x66   : > { %s288_s4 = sshll.u32 %s281_s3, 4  ;;  %p1966_p12 = pnand %p1333_p11, %p1929_p0  ;;  %s289_s4 = int_to_ptr.vmem [resolvable:$true] %s288_s4 }
  0x67   : > { %s278_s12 = scalar_lea.sflag [#allocation7], %s277_s15  ;;  %s1626_s19 = scalar_lea.vmem %s289_s4, 256 }
  0x68   : > { %p1615_p13 = pneg %p1966_p12  ;;  %p1627_p5 = scmp.ne.s32.totalorder %s289_s4, %s1626_s19 }
  0x69   : > { %s1762_s20 = smov [#allocation6]  }
  0x6a   : > { %p1629_p2 = pnand %p1627_p5, %p1615_p13  ;;  %s1631_s13 = sshll.u32 %s1762_s20, 4  ;;  %s1632_s13 = int_to_ptr.vmem [resolvable:$false] %s1631_s13 }
  0x6b   : > { %s1633_s1 = scalar_lea.vmem %s1632_s13, 512  ;;  %p1634_p8 = scmp.lt.s32.totalorder %s289_s4, %s1632_s13 }
  0x6c   : > { %p1630_p4 = pneg %p1629_p2  ;;  %p1635_p6 = scmp.lt.s32.totalorder %s1633_s1, %s1626_s19 }
  0x6e   : > { %p1636_p10 = por %p1635_p6, %p1634_p8 }
  0x70   : > { %p1637_p9 = pnand %p1636_p10, %p1630_p4 }
  0x72   : > { %1640 = shalt.err (!%p1637_p9)
}
  0x73   : > { %s2143_s3 = smov 8   ;;  %300 = sbr.rel (%p1857_p3) target bundleno = 1628 (0x65c), region = 44 }
  0x74   : > { %1323 = dma.hbm_to_vmem [thread:$0]  (!%p1966_p12), %s287_s2, 256, %s289_s4, %s278_s12, %s2132_s18, %s2132_s18, %s2143_s3  }
  0x75   : > { %s1980_s16 = sand.u32 (!%p1857_p3), 1, %s1725_s22  }
  0x76   : > { %s1158_s13 = sshll.u32 (!%p1857_p3), %s1980_s16, 4  ;;  %s303_s8 = scalar_lea.sflag (!%p1857_p3), [#allocation7], %s1980_s16 }
  0x77   : > { %s1984_s15 = scalar_lea.vmem (!%p1857_p3), [#allocation6], %s1158_s13 }
  0x78   : > { %1700 = dma.done.wait (%p1939_p7), %s303_s8, 256  }
  0x79   : > { %1702 = vsyncadd (%p1939_p7), %s303_s8, 4294967040 }
  0x7a   : > { %1704 = dma.done.wait (%p1852_p1), [#allocation10], 960  }
  0x7b   : > { %1706 = vsyncadd (%p1852_p1), [#allocation10], 4294966336 }
  0x7c   : > { %1708 = dma.done.wait (%p1852_p1), [#allocation13], 3328  }
  0x7d   : > { %1710 = vsyncadd (%p1852_p1), [#allocation13], 4294963968 }
  0x7e   : > { %1712 = dma.done.wait (%p1852_p1), [#allocation16], 256  }
  0x7f   : > { %1714 = vsyncadd (%p1852_p1), [#allocation16], 4294967040  ;;  %s2002_s2 = scalar_lea.vmem [#allocation17], %s1158_s13  ;;  %p1165_p3 = scmp.ne.s32.totalorder %s1733_s24, 0 }
  0x81   : > { %361 = sbr.rel (%p1165_p3) target bundleno = 357 (0x165), region = 72 }
  0x86   : > { %v369_v0 = vld [vmem:[#allocation9 + $0x20] sm:$0x11]  ;;  %vm399_vm0 = vcmask 1040384   ;;  %v1763_v2 = vmov 0   ;;  %v1426_v7 = vld [vmem:[#allocation9 + $0x14] ss:$8 sps:$4 sm:$0xff]  }
  0x87   : > { %v1171_v1 = vcombine.high %v369_v0, %v369_v0  ;;  %v401_v3 = vsel %vm399_vm0, 65535, %v1763_v2  ;;  %v1170_v4 = vcombine.low %v369_v0, %v369_v0  ;;  %440 = vmatprep.mubr.bf16.mxu0 %v1763_v2  ;;  %v1428_v8 = vld [vmem:[#allocation9 + $0x10] ss:$8 sps:$4 sm:$0xff]   ;;  %v1429_v9 = vld [vmem:[#allocation9 + $0x4] ss:$8 sps:$4 sm:$0xff]   ;;  %vm395_vm1 = vcmask 269312  }
  0x88   : > { %v1431_v10 = vld [vmem:[#allocation9] ss:$8 sps:$4 sm:$0xff]   ;;  %vm471_vm2 = vcmask 7168   ;;  %v1764_v14 = vmov -inf   ;;  %v1765_v15 = vmov 0.0   ;;  %v455_v18 = vld [vmem:[#allocation15] sm:$0xff] }
  0x89   : > { %v406_v5 = vand.u32 %v1171_v1, %v401_v3  ;;  %v403_v6 = vand.u32 %v1170_v4, %v401_v3  ;;  %v362_v11 = vld [vmem:[%s1984_s15] sm:$0xff]  ;;  %v363_v12 = vld [vmem:[%s1984_s15 + $0x8] sm:$0xff]  ;;  %472 = vst.msk [vmem:[#allocation3] sm:$0xff] %vm471_vm2, %v1764_v14  ;;  %473 = vst.msk [vmem:[#allocation3 + $0x8] sm:$0xff] %vm471_vm2, %v1764_v14 }
  0x8a   : > { %v364_v13 = vpack.c.bf16 %v363_v12, %v362_v11  ;;  %474 = vst.msk [vmem:[#allocation4] sm:$0xff] %vm471_vm2, %v1765_v15  ;;  %475 = vst.msk [vmem:[#allocation4 + $0x8] sm:$0xff] %vm471_vm2, %v1765_v15  ;;  %v451_v19 = vld [vmem:[#allocation14] sm:$0xff]  ;;  %v452_v21 = vld [vmem:[#allocation14 + $0x8] sm:$0xff] }
  0x8b   : > { %418 = vmatprep.subr.bf16.mxu0 %v406_v5  ;;  %476 = vst [vmem:[#allocation5] sm:$0xff] %v1765_v15  ;;  %477 = vst [vmem:[#allocation5 + $0x8] sm:$0xff] %v1765_v15  ;;  %v456_v22 = vld [vmem:[#allocation15 + $0x8] sm:$0xff] }
  0x8c   : > { %419 = vmatpush1.bf16.msra.mxu0 %v403_v6 }
  0x8d   : > { %420 = vmatprep.subr.bf16.mxu0 %v1426_v7 }
  0x90   : > { %421 = vmatpush1.bf16.msra.mxu0 %v1428_v8 }
  0x91   : > { %422 = vmatprep.subr.bf16.mxu0 %v1429_v9 }
  0x94   : > { %423 = vmatpush1.bf16.msra.mxu0 %v1431_v10 }
  0x97   : > { %1172 = vmatmul.mubr.msk.bf16.vlgmr.msra.gmra.mxu0 %vm395_vm1, %v364_v13 }
 0x157   : > { %v442_v16 = vpop.f32.mrf.mxu0 }
 0x158   : > { %v453_v25 = vmul.f32 %v451_v19, %v442_v16 }
 0x159   : > { %v444_v17 = vpop.f32.mrf.mxu0 }
 0x15a   : > { %v457_v23 = vmul.f32 %v455_v18, %v444_v17 }
 0x15b   : > { %v446_v20 = vpop.f32.mrf.mxu0 }
 0x15c   : > { %v454_v26 = vmul.f32 %v452_v21, %v446_v20  ;;  %v459_v28 = vadd.f32 %v457_v23, %v453_v25 }
 0x15d   : > { %v448_v24 = vpop.f32.mrf.mxu0 }
 0x15e   : > { %v458_v27 = vmul.f32 %v456_v22, %v448_v24 }
 0x160   : > { %v460_v29 = vadd.f32 %v458_v27, %v454_v26 }
 0x162   : > { %v1219_v30 = vpack.c.bf16 %v460_v29, %v459_v28 }
 0x164   : > { %1220 = vst [vmem:[#allocation2] sm:$0xff] %v1219_v30  }
 0x165 PF: > { %v1434_v31 = vld [vmem:[#allocation11 + $0x10] ss:$0 sps:$4 sm:$0x11]   ;;  %v1766_v32 = vmov 0.0   ;;  %vm510_vm3 = vcmask 1040384   ;;  %v1767_v33 = vmov 0  }
 0x166   : > { %1238 = vmatprep.subr.bf16.mxu0 %v1766_v32  ;;  %v512_v34 = vsel %vm510_vm3, 65535, %v1767_v33  ;;  %749 = vmatprep.mubr.bf16.mxu1 %v1767_v33  ;;  %s2009_s4 = sshll.u32 %s1733_s24, 3  ;;  %vm1768_vm4 = vmmov 0   ;;  %v1437_v36 = vld [vmem:[#allocation12 + $0xac] ss:$12 sps:$4 sm:$0xff]   ;;  %vm506_vm5 = vcmask 269312  }
 0x167   : > { %1432 = vset.pattern.permute.xlu1 %v1767_v33  ;;  %v514_v35 = vand.u32 %v1434_v31, %v512_v34  ;;  %1433 = vset.pattern.permute.xlu0 %v1767_v33  ;;  %v1439_v37 = vld [vmem:[#allocation12 + $0xa8] ss:$12 sps:$4 sm:$0xff]   ;;  %s479_s5 = scalar_lea.vmem %s1984_s15, %s2009_s4 [#allocation6]  ;;  %v1443_v40 = vld [vmem:[#allocation12 + $0x90] ss:$12 sps:$4 sm:$0xff]   ;;  %v1447_v44 = vld [vmem:[#allocation12 + $0x78] ss:$12 sps:$4 sm:$0xff]  }
 0x168   : > { %1244 = vmatprep.mubr.msk.bf16.mxu0 %vm1768_vm4, %v1766_v32  ;;  %v1435_v38 = vld [vmem:[#allocation11 + $0x8] sm:$0xff]   ;;  %717 = vmatprep.subr.bf16.mxu1 %v1437_v36  ;;  %v1436_v41 = vld [vmem:[#allocation11] sm:$0xff]   ;;  %v1445_v43 = vld [vmem:[#allocation12 + $0x7c] ss:$12 sps:$4 sm:$0xff]   ;;  %s481_s30 = scalar_lea.vmem [#allocation14], %s2009_s4  ;;  %s483_s7 = scalar_lea.vmem [#allocation15], %s2009_s4 }
 0x169   : > { %1239 = vmatpush3.bf16.msra.mxu0 %v514_v35  ;;  %v1441_v39 = vld [vmem:[#allocation12 + $0x94] ss:$12 sps:$4 sm:$0xff]   ;;  %718 = vmatpush1.bf16.msra.mxu1 %v1439_v37  ;;  %v480_v42 = vld [vmem:[%s479_s5] sm:$0xff]  ;;  %v1444_v50 = vld [vmem:[#allocation12 + $0x98] ss:$12 sps:$4 sm:$0xff]   ;;  %vm918_vm6 = vcmask 1043456  }
 0x16a   : > { %1240 = vmatprep.subr.bf16.mxu0 %v1766_v32  ;;  %719 = vmatprep.subr.bf16.mxu1 %v1441_v39  ;;  %v485_v45 = vpack.c.bf16 %v480_v42, %v480_v42  ;;  %v1449_v46 = vld [vmem:[#allocation12 + $0x64] ss:$12 sps:$4 sm:$0xff]   ;;  %v1451_v48 = vld [vmem:[#allocation12 + $0x60] ss:$12 sps:$4 sm:$0xff]   ;;  %v1455_v52 = vld [vmem:[#allocation12 + $0x48] ss:$12 sps:$4 sm:$0xff]  }
 0x16b   : > { %v1440_v47 = vld [vmem:[#allocation12 + $0xb0] ss:$12 sps:$4 sm:$0xff]   ;;  %v1453_v49 = vld [vmem:[#allocation12 + $0x4c] ss:$12 sps:$4 sm:$0xff]   ;;  %v1457_v53 = vld [vmem:[#allocation12 + $0x34] ss:$12 sps:$4 sm:$0xff]  }
 0x16c   : > { %v1448_v51 = vld [vmem:[#allocation12 + $0x80] ss:$12 sps:$4 sm:$0xff]   ;;  %v1459_v54 = vld [vmem:[#allocation12 + $0x30] ss:$12 sps:$4 sm:$0xff]   ;;  %v1452_v56 = vld [vmem:[#allocation12 + $0x68] ss:$12 sps:$4 sm:$0xff]  }
 0x16d   : > { %1241 = vmatpush3.bf16.msra.mxu0 %v1435_v38  ;;  %720 = vmatpush1.bf16.msra.mxu1 %v1443_v40  ;;  %v1461_v55 = vld [vmem:[#allocation12 + $0x1c] ss:$12 sps:$4 sm:$0xff]   ;;  %v1463_v57 = vld [vmem:[#allocation12 + $0x18] ss:$12 sps:$4 sm:$0xff]   ;;  %v1464_v61 = vld [vmem:[#allocation12 + $0x20] ss:$12 sps:$4 sm:$0xff]  }
 0x16e   : > { %1242 = vmatprep.subr.bf16.mxu0 %v1766_v32  ;;  %721 = vmatprep.subr.bf16.mxu1 %v1445_v43  ;;  %v1465_v58 = vld [vmem:[#allocation12 + $0x4] ss:$12 sps:$4 sm:$0xff]   ;;  %v1467_v62 = vld [vmem:[#allocation12] ss:$12 sps:$4 sm:$0xff]   ;;  %v1468_v63 = vld [vmem:[#allocation12 + $0x8] ss:$12 sps:$4 sm:$0xff]  }
 0x16f   : > { %v1456_v59 = vld [vmem:[#allocation12 + $0x50] ss:$12 sps:$4 sm:$0xff]   ;;  %v1460_v60 = vld [vmem:[#allocation12 + $0x38] ss:$12 sps:$4 sm:$0xff]   ;;  %vm853_vm7 = vcmask 64512   ;;  %vm896_vm8 = vcmask 7168  }
 0x170   : > { %v482_v5 = vld [vmem:[%s481_s30] sm:$0xff]  ;;  %v851_v28 = vld [vmem:[#allocation3] sm:$0xff]  ;;  %v852_v31 = vld [vmem:[#allocation3 + $0x8] sm:$0xff]  ;;  %p1206_p1 = scmp.ne.s32.totalorder %s1733_s24, 1 }
 0x171   : > { %1243 = vmatpush3.bf16.msra.mxu0 %v1436_v41  ;;  %722 = vmatpush1.bf16.msra.mxu1 %v1447_v44  ;;  %v484_v8 = vld [vmem:[%s483_s7] sm:$0xff] }
 0x172   : > { %1248 = vmatprep.subr.bf16.mxu0 %v1766_v32  ;;  %723 = vmatprep.subr.bf16.mxu1 %v1449_v46  ;;  %v1469_v20 = vld [vmem:[#allocation2] sm:$0xff]  }
 0x174   : > { %1245 = vmatmul.mubr.msk.bf16.vlgmr.msra.gmra.mxu0 %vm506_vm5, %v485_v45 }
 0x175   : > { %1249 = vmatpush3.bf16.msra.mxu0 %v1440_v47  ;;  %1264 = vmatprep.mubr.msk.bf16.mxu0 %vm1768_vm4, %v1766_v32 }
 0x176   : > { %1250 = vmatprep.subr.bf16.mxu0 %v1766_v32  ;;  %724 = vmatpush1.bf16.msra.mxu1 %v1451_v48 }
 0x177   : > { %725 = vmatprep.subr.bf16.mxu1 %v1453_v49 }
 0x179   : > { %1251 = vmatpush3.bf16.msra.mxu0 %v1444_v50 }
 0x17a   : > { %1252 = vmatprep.subr.bf16.mxu0 %v1766_v32  ;;  %726 = vmatpush1.bf16.msra.mxu1 %v1455_v52 }
 0x17b   : > { %727 = vmatprep.subr.bf16.mxu1 %v1457_v53 }
 0x17d   : > { %1253 = vmatpush3.bf16.msra.mxu0 %v1448_v51  ;;  %v884_v51 = vld [vmem:[#allocation4] sm:$0xff] }
 0x17e   : > { %1254 = vmatprep.subr.bf16.mxu0 %v1766_v32  ;;  %728 = vmatpush1.bf16.msra.mxu1 %v1459_v54  ;;  %v885_v54 = vld [vmem:[#allocation4 + $0x8] sm:$0xff] }
 0x17f   : > { %729 = vmatprep.subr.bf16.mxu1 %v1461_v55 }
 0x181   : > { %1255 = vmatpush3.bf16.msra.mxu0 %v1452_v56 }
 0x182   : > { %1256 = vmatprep.subr.bf16.mxu0 %v1766_v32  ;;  %730 = vmatpush1.bf16.msra.mxu1 %v1463_v57 }
 0x183   : > { %731 = vmatprep.subr.bf16.mxu1 %v1465_v58 }
 0x185   : > { %1257 = vmatpush3.bf16.msra.mxu0 %v1456_v59  ;;  %v899_v59 = vld [vmem:[#allocation5] sm:$0xff] }
 0x186   : > { %1258 = vmatprep.subr.bf16.mxu0 %v1766_v32  ;;  %732 = vmatpush1.bf16.msra.mxu1 %v1467_v62  ;;  %v900_v62 = vld [vmem:[#allocation5 + $0x8] sm:$0xff] }
 0x187   : > { %1268 = vmatprep.subr.bf16.mxu1 %v1766_v32 }
 0x189   : > { %1259 = vmatpush3.bf16.msra.mxu0 %v1460_v60 }
 0x18a   : > { %1260 = vmatprep.subr.bf16.mxu0 %v1766_v32 }
 0x18d   : > { %1261 = vmatpush3.bf16.msra.mxu0 %v1464_v61 }
 0x18e   : > { %1262 = vmatprep.subr.bf16.mxu0 %v1766_v32 }
 0x191   : > { %1263 = vmatpush3.bf16.msra.mxu0 %v1468_v63 }
 0x234   : > { %v550_v0 = vpop.f32.mrf.mxu0 }
 0x235   : > { %v556_v1 = vpack.c.bf16 %v550_v0, %v550_v0 }
 0x236   : > { %v1246_v2 = vpop.f32.mrf.mxu0 }
 0x237   : > { %750 = vmatmul.mubr.bf16.vlgmr.msra.gmra.mxu1 %v556_v1  ;;  %1265 = vmatmul.mubr.bf16.vlgmr.msra.gmra.mxu0 %v556_v1 }
 0x238   : > { %v553_v3 = vpop.f32.mrf.mxu0  ;;  %1270 = vmatprep.mubr.msk.bf16.mxu1 %vm1768_vm4, %v1766_v32 }
 0x23a   : > { %v1247_v4 = vpop.f32.mrf.mxu0 }
 0x2f7   : > { %v751_v6 = vpop.f32.mrf.mxu1  ;;  %v792_v7 = vpop.f32.mrf.mxu0 }
 0x2f8   : > { %v798_v11 = vmul.f32 %v751_v6, %v482_v5  ;;  %v914_v19 = vpack.c.bf16 %v792_v7, %v792_v7 }
 0x2f9   : > { %v753_v9 = vpop.f32.mrf.mxu1  ;;  %v1266_v10 = vpop.f32.mrf.mxu0 }
 0x2fa   : > { %v799_v12 = vmul.f32 %v753_v9, %v484_v8  ;;  %v920_v21 = vsel %vm918_vm6, %v914_v19, 0 }
 0x2fb   : > { %v755_v13 = vpop.f32.mrf.mxu1  ;;  %v795_v14 = vpop.f32.mrf.mxu0 }
 0x2fc   : > { %v800_v15 = vadd.f32 %v799_v12, %v798_v11 }
 0x2fd   : > { %v756_v16 = vpop.f32.mrf.mxu1  ;;  %v1267_v17 = vpop.f32.mrf.mxu0 }
 0x2fe   : > { %v801_v18 = vpack.c.bf16 %v800_v15, %v800_v15 }
 0x300   : > { %1269 = vmatpush3.bf16.xpose.msra.mxu1 %v801_v18 }
 0x301   : > { %1274 = vmatprep.subr.bf16.mxu1 %v1766_v32 }
 0x307   : > { %1271 = vmatmul.mubr.bf16.vlgmr.msra.gmra.mxu1 %v1469_v20 }
 0x308   : > { %1275 = vmatpush3.bf16.msra.mxu1 %v920_v21  ;;  %1276 = vmatprep.mubr.msk.bf16.mxu1 %vm1768_vm4, %v1766_v32 }
 0x3c7   : > { %v844_v22 = vpop.f32.mrf.mxu1 }
 0x3c8   : > { %v854_v23 = vsel %vm853_vm7, %v844_v22, -inf }
 0x3c9   : > { %855 = vmax.xlane.f32.xlu0 %v854_v23  ;;  %v1272_v24 = vpop.f32.mrf.mxu1 }
 0x3cb   : > { %v847_v25 = vpop.f32.mrf.mxu1 }
 0x3cc   : > { %v857_v26 = vsel %vm853_vm7, %v847_v25, -inf }
 0x3cd   : > { %858 = vmax.xlane.f32.xlu0 %v857_v26  ;;  %v1273_v27 = vpop.f32.mrf.mxu1 }
 0x452   : > { %v856_v29 = vpop.xlane.xlu0 %855 }
 0x453   : > { %v860_v30 = vmax.f32 %v851_v28, %v856_v29 }
 0x455   : > { %v862_v33 = vsub.f32 %v851_v28, %v860_v30  ;;  %967 = vst.msk [vmem:[#allocation3] sm:$0xff] %vm896_vm8, %v860_v30  ;;  %870 = vperm.xlu1 %1432, %v860_v30  }
 0x456   : > { %v859_v32 = vpop.xlane.xlu0 %858 }
 0x457   : > { %v861_v34 = vmax.f32 %v852_v31, %v859_v32  ;;  %v864_v48 = vmul.f32 1.442695, %v862_v33 }
 0x459   : > { %v863_v35 = vsub.f32 %v852_v31, %v861_v34  ;;  %968 = vst.msk [vmem:[#allocation3 + $0x8] sm:$0xff] %vm896_vm8, %v861_v34  ;;  %875 = vperm.xlu1 %1432, %v861_v34  }
 0x45b   : > { %v866_v45 = vmul.f32 1.442695, %v863_v35 }
 0x4d0   : > { %v871_v36 = vpop.permute.xlu1 %870 }
 0x4d1   : > { %v878_v37 = vsub.f32 %v844_v22, %v871_v36 }
 0x4d3   : > { %v880_v38 = vmul.f32 1.442695, %v878_v37 }
 0x4d4   : > { %v876_v39 = vpop.permute.xlu1 %875 }
 0x4d5   : > { %1470 = vpow2.f32 %v880_v38  ;;  %v879_v40 = vsub.f32 %v847_v25, %v876_v39 }
 0x4d7   : > { %v882_v41 = vmul.f32 1.442695, %v879_v40 }
 0x4d9   : > { %1472 = vpow2.f32 %v882_v41 }
 0x4da   : > { %1474 = vpow2.f32 %v866_v45 }
 0x4db   : > { %1476 = vpow2.f32 %v864_v48 }
 0x4e2   : > { %v1471_v42 = vpop.eup %1470 }
 0x4e3   : > { %v888_v43 = vsel %vm853_vm7, %v1471_v42, 0.0 }
 0x4e4   : > { %889 = vadd.xlane.f32.xlu0 %v888_v43 }
 0x4e6   : > { %v1473_v44 = vpop.eup %1472 }
 0x4e7   : > { %v891_v46 = vsel %vm853_vm7, %v1473_v44, 0.0  ;;  %v913_v47 = vpack.c.bf16 %v1473_v44, %v1471_v42  ;;  %v1475_v49 = vpop.eup %1474 }
 0x4e8   : > { %892 = vadd.xlane.f32.xlu1 %v891_v46  ;;  %v1477_v50 = vpop.eup %1476  ;;  %v887_v56 = vmul.f32 %v1475_v49, %v885_v54 }
 0x4e9   : > { %1277 = vmatmul.mubr.msk.bf16.vlgmr.msra.gmra.mxu1 %vm853_vm7, %v913_v47  ;;  %v886_v52 = vmul.f32 %v1477_v50, %v884_v51 }
 0x4f9   : > { %908 = vperm.xlu1 %1432, %v1475_v49  }
 0x4fa   : > { %903 = vperm.xlu0 %1433, %v1477_v50  }
 0x56d   : > { %v890_v53 = vpop.xlane.xlu0 %889 }
 0x56e   : > { %v894_v55 = vadd.f32 %v890_v53, %v886_v52 }
 0x570   : > { %897 = vst.msk [vmem:[#allocation4] sm:$0xff] %vm896_vm8, %v894_v55 }
 0x571   : > { %v893_v57 = vpop.xlane.xlu1 %892 }
 0x572   : > { %v895_v58 = vadd.f32 %v893_v57, %v887_v56 }
 0x574   : > { %898 = vst.msk [vmem:[#allocation4 + $0x8] sm:$0xff] %vm896_vm8, %v895_v58 }
 0x575   : > { %v904_v60 = vpop.permute.xlu0 %903  ;;  %v909_v63 = vpop.permute.xlu1 %908 }
 0x576   : > { %v911_v61 = vmul.f32 %v904_v60, %v899_v59  ;;  %v912_v3 = vmul.f32 %v909_v63, %v900_v62 }
 0x5a9   : > { %v956_v0 = vpop.f32.mrf.mxu1 }
 0x5aa   : > { %v963_v1 = vadd.f32 %v956_v0, %v911_v61 }
 0x5ab   : > { %v1278_v2 = vpop.f32.mrf.mxu1 }
 0x5ac   : > { %965 = vst [vmem:[#allocation5] sm:$0xff] %v963_v1  ;;  %972 = sbr.rel (%p1206_p1) target bundleno = 1603 (0x643), region = 76 }
 0x5ad   : > { %v959_v4 = vpop.f32.mrf.mxu1 }
 0x5ae   : > { %v964_v5 = vadd.f32 %v959_v4, %v912_v3 }
 0x5af   : > { %v1279_v6 = vpop.f32.mrf.mxu1 }
 0x5b0   : > { %966 = vst [vmem:[#allocation5 + $0x8] sm:$0xff] %v964_v5 }
 0x5b1   : > { %v975_v7 = vld [vmem:[#allocation4] sm:$0xff]  ;;  %v976_v8 = vld [vmem:[#allocation4 + $0x8] sm:$0xff]  ;;  %v1769_v9 = vmov 0  }
 0x5b2   : > { %1478 = vset.pattern.permute.xlu0 %v1769_v9  ;;  %1479 = vrcp.f32 %v975_v7 }
 0x5b3   : > { %1481 = vrcp.f32 %v976_v8  ;;  %v973_v12 = vld [vmem:[#allocation5] sm:$0xff] }
 0x5b7   : > { %v974_v15 = vld [vmem:[#allocation5 + $0x8] sm:$0xff] }
 0x5bf   : > { %v1480_v10 = vpop.eup %1479 }
 0x5c0   : > { %981 = vperm.xlu0 %1478, %v1480_v10   ;;  %v1482_v11 = vpop.eup %1481 }
 0x5c4   : > { %986 = vperm.xlu0 %1478, %v1482_v11  }
 0x63b   : > { %v982_v13 = vpop.permute.xlu0 %981 }
 0x63c   : > { %v989_v14 = vmul.f32 %v982_v13, %v973_v12 }
 0x63e   : > { %991 = vst [vmem:[%s2002_s2] sm:$0xff] %v989_v14 }
 0x63f   : > { %v987_v16 = vpop.permute.xlu0 %986 }
 0x640   : > { %v990_v17 = vmul.f32 %v987_v16, %v974_v15 }
 0x642   : > { %992 = vst [vmem:[%s2002_s2 + $0x8] sm:$0xff] %v990_v17 }
 0x643 PF: > { %s1215_s24 = sshll.u32 %s1737_s25, 8  ;;  %s1007_s11 = sshll.u32 %s2002_s2, 4  ;;  %s2054_s11 = int_to_ptr.vmem [resolvable:$true] %s1007_s11 }
 0x644   : > { %s2051_s9 = scalar_lea.hbm %s2113_s6, %s1215_s24  ;;  %s994_s10 = scalar_lea.sflag [#allocation8], %s1980_s16 }
 0x645   : > { %s1641_s19 = scalar_lea.vmem %s2054_s11, 256  ;;  %p2144_p7 = scmp.ne.s32.totalorder %s2140_s29, 0 }
 0x646   : > { %p1642_p0 = scmp.ne.s32.totalorder %s2054_s11, %s1641_s19  ;;  %s1770_s20 = smov [#allocation17]  }
 0x647   : > { %s1645_s1 = sshll.u32 %s1770_s20, 4  ;;  %s1646_s1 = int_to_ptr.vmem [resolvable:$false] %s1645_s1 }
 0x648   : > { %p1643_p9 = pnand %p1642_p0, %p2144_p7  ;;  %s1647_s25 = scalar_lea.vmem %s1646_s1, 512 }
 0x649   : > { %p1648_p11 = scmp.lt.s32.totalorder %s2054_s11, %s1646_s1  ;;  %p1649_p12 = scmp.lt.s32.totalorder %s1647_s25, %s1641_s19 }
 0x64a   : > { %p1644_p10 = pneg %p1643_p9 }
 0x64b   : > { %p1650_p13 = por %p1649_p12, %p1648_p11 }
 0x64d   : > { %p1651_p5 = pnand %p1650_p13, %p1644_p10 }
 0x64f   : > { %1654 = shalt.err (!%p1651_p5)
}
 0x650   : > { %s1655_s3 = scalar_lea.hbm %s2051_s9, 256  ;;  %s1659_s15 = scalar_lea.hbm %s2113_s6, 512 }
 0x651   : > { %p1656_p2 = scmp.ne.s32.totalorder %s2051_s9, %s1655_s3  ;;  %p1660_p6 = scmp.lt.s32.totalorder %s2051_s9, %s2113_s6 }
 0x652   : > { %p1661_p3 = scmp.lt.s32.totalorder %s1659_s15, %s1655_s3 }
 0x653   : > { %p1657_p4 = pnand %p1656_p2, %p2144_p7 }
 0x654   : > { %p1662_p1 = por %p1661_p3, %p1660_p6 }
 0x655   : > { %p1658_p8 = pneg %p1657_p4 }
 0x657   : > { %p1663_p0 = pnand %p1662_p1, %p1658_p8 }
 0x659   : > { %1666 = shalt.err (!%p1663_p0)
}
 0x65a   : > { %s1771_s5 = smov 128   ;;  %s1772_s30 = smov 8  }
 0x65b   : > { %1302 = dma.vmem_to_hbm [thread:$0]  (%p2144_p7), %s2054_s11, 256, %s2051_s9, %s994_s10, %s1771_s5, %s1771_s5, %s1772_s30  }
 0x65c PF: > { %p1339_p9 = scmp.ge.s32.totalorder %s1749_s28, 2  ;;  %s1022_s7 = sand.u32 1, %s1721_s21  }
 0x65d   : > { %p2145_p10 = scmp.ne.s32.totalorder %s2141_s17, 0  ;;  %s1023_s24 = scalar_lea.sflag [#allocation8], %s1022_s7 }
 0x65f   : > { %p1325_p11 = pnand %p1339_p9, %p2145_p10 }
 0x661   : > { %p1326_p12 = pneg %p1325_p11 }
 0x663   : > { %1716 = dma.done.wait (%p1326_p12), %s1023_s24, 256  }
 0x664   : > { %1718 = vsyncadd (%p1326_p12), %s1023_s24, 4294967040  ;;  %s25_s28 = sadd.s32 1, %s1749_s28   ;;  %s2146_s29 = sld [smem:[#allocation23_spill]] }
 0x665   : > { %p22_p13 = scmp.ge.s32.totalorder %s25_s28, 6   ;;  %s2147_s16 = sld [smem:[#allocation24_spill]] }
 0x666   : > { %s2148_s21 = smov %s1725_s22  ;;  %s2149_s22 = smov %s1729_s23 }
 0x667   : > { %s2150_s23 = smov %s1958_s14  ;;  %s2151_s24 = smov %s1741_s26 }
 0x668   : > { %s2152_s25 = smov %s1745_s27  ;;  %24 = sbr.rel (!%p22_p13) target bundleno = 16 (0x10), region = 120 }
 0x66a   : > { %s2153_s26 = smov %s2146_s29 }
 0x66b   : > { %s2154_s27 = smov %s2147_s16 }
 0x66d   :  { %1028 = vsyncpa [#allocation7], 1 }
 0x66e   :  { %1030 = vsyncpa [#allocation7 + $0x1], 1 }
 0x66f   :  { %1031 = vsyncpa [#allocation10], 1 }
 0x670   :  { %1032 = vsyncpa [#allocation13], 1 }
 0x671   :  { %1033 = vsyncpa [#allocation16], 1 }
 0x672   :  { %1034 = vsyncpa [#allocation8], 1 }
 0x673   :  { %1036 = vsyncpa [#allocation8 + $0x1], 1 }

// kernel: tpu_custom_call.1
= control target key start
LH: loop header
LB: loop body
LE: loop exit
PB: predicated region body
PF: predicated region fallthrough
CT: control target
= control target key end

     0   :  { %s2107_s0 = inlined_call_operand.hbm [shape: f32[32,33], index: 0, kind: input, shape index: {}]   ;;  %s2108_s1 = inlined_call_operand.hbm [shape: bf16[33,256], index: 1, kind: input, shape index: {}]   ;;  %s2109_s2 = inlined_call_operand.hbm [shape: bf16[33,128], index: 2, kind: input, shape index: {}]   ;;  %s2110_s3 = inlined_call_operand.hbm [shape: bf16[128,384], index: 3, kind: input, shape index: {}]   ;;  %s2111_s4 = inlined_call_operand.hbm [shape: f32[16,128], index: 4, kind: input, shape index: {}]   ;;  %s2112_s5 = inlined_call_operand.hbm [shape: f32[16,128], index: 5, kind: input, shape index: {}]   ;;  %s2113_s6 = inlined_call_operand.hbm [shape: f32[32,128], index: 6, kind: output, shape index: {}]  }
   0x1   :  { %2120 = sst [smem:[#allocation25_spill]] %s2108_s1 }
   0x2   :  { %2121 = sst [smem:[#allocation26_spill]] %s2109_s2 }
   0x3   :  { %2122 = sst [smem:[#allocation27_spill]] %s2110_s3 }
   0x4   :  { %2123 = sst [smem:[#allocation28_spill]] %s2111_s4 }
   0x5   :  { %2124 = sst [smem:[#allocation29_spill]] %s2112_s5 }
   0x6   :  { %11 = vsyncpa [#allocation7], 0 }
   0x7   :  { %13 = vsyncpa [#allocation7 + $0x1], 0 }
   0x8   :  { %14 = vsyncpa [#allocation10], 0 }
   0x9   :  { %15 = vsyncpa [#allocation13], 0 }
   0xa   :  { %16 = vsyncpa [#allocation16], 0 }
   0xb   :  { %17 = vsyncpa [#allocation8], 0 }
   0xc   :  { %19 = vsyncpa [#allocation8 + $0x1], 0  ;;  %s1808_s21 = smov 0   ;;  %s1810_s22 = smov 0  }
   0xd   :  { %s1812_s23 = smov 0   ;;  %s1814_s24 = smov 0  }
   0xe   :  { %s1816_s25 = smov 0   ;;  %s1818_s26 = smov 0  }
   0xf   :  { %s1820_s27 = smov 0   ;;  %s1822_s28 = smov 0  }
  0x10 LB: > { %s2114_s29 = sadd.s32 4294967295, %s1749_s28   ;;  %p1147_p0 = scmp.ge.s32.totalorder %s1749_s28, 1  ;;  %s1749_s28 = sphi %s1822_s28, %s25_s28   ;;  %s1745_s27 = sphi %s1820_s27, %s2154_s27   ;;  %s1741_s26 = sphi %s1818_s26, %s2153_s26   ;;  %s1737_s25 = sphi %s1816_s25, %s2152_s25   ;;  %s1733_s24 = sphi %s1814_s24, %s2151_s24   ;;  %s1729_s23 = sphi %s1812_s23, %s2150_s23   ;;  %s1725_s22 = sphi %s1810_s22, %s2149_s22   ;;  %s1721_s21 = sphi %s1808_s21, %s2148_s21  }
  0x11   : > { %p1852_p1 = scmp.eq.s32.totalorder %s2114_s29, 0  ;;  %p199_p2 = scmp.lt.s32.totalorder %s1749_s28, 5 }
  0x12   : > { %s1751_s8 = smov [#allocation9]   ;;  %s1752_s11 = smov [#allocation12]  }
  0x13   : > { %p1857_p3 = pnand %p1147_p0, %p199_p2  ;;  %s211_s9 = sshll.u32 %s1751_s8, 4  ;;  %s212_s9 = int_to_ptr.vmem [resolvable:$true] %s211_s9 }
  0x14   : > { %s237_s12 = sshll.u32 %s1752_s11, 4  ;;  %s1494_s14 = scalar_lea.vmem %s212_s9, 640  ;;  %s238_s12 = int_to_ptr.vmem [resolvable:$true] %s237_s12 }
  0x15   : > { %p1304_p4 = pneg %p1857_p3  ;;  %p1495_p7 = scmp.ne.s32.totalorder %s212_s9, %s1494_s14 }
  0x16   : > { %p1502_p10 = scmp.lt.s32.totalorder %s212_s9, %s212_s9  ;;  %p1503_p11 = scmp.lt.s32.totalorder %s1494_s14, %s1494_s14 }
  0x17   : > { %p1865_p5 = pnand %p1304_p4, %p1852_p1 }
  0x18   : > { %p1504_p12 = por %p1503_p11, %p1502_p10 }
  0x19   : > { %p1871_p6 = pneg %p1865_p5 }
  0x1b   : > { %p1497_p8 = pnand %p1495_p7, %p1871_p6 }
  0x1d   : > { %p1498_p9 = pneg %p1497_p8 }
  0x1f   : > { %p1505_p13 = pnand %p1504_p12, %p1498_p9 }
  0x21   : > { %1508 = shalt.err (!%p1505_p13)
}
  0x22   : > { %s2115_s15 = smov 128   ;;  %s2117_s16 = smov 8  }
  0x23   : > { %s2129_s1 = sld [smem:[#allocation25_spill]]  ;;  %s1520_s19 = scalar_lea.vmem %s238_s12, 3072 }
  0x24   : > { %p1521_p0 = scmp.ne.s32.totalorder %s238_s12, %s1520_s19  ;;  %p1528_p7 = scmp.lt.s32.totalorder %s238_s12, %s238_s12 }
  0x25   : > { %p1529_p8 = scmp.lt.s32.totalorder %s1520_s19, %s1520_s19 }
  0x26   : > { %p1523_p2 = pnand %p1521_p0, %p1871_p6 }
  0x27   : > { %p1530_p9 = por %p1529_p8, %p1528_p7 }
  0x28   : > { %p1524_p4 = pneg %p1523_p2 }
  0x29   : > { %1307 = dma.hbm_to_vmem [thread:$0]  (!%p1865_p5), %s2129_s1, 640, %s212_s9, [#allocation10], %s2115_s15, %s2115_s15, %s2117_s16  }
  0x2a   : > { %p1531_p10 = pnand %p1530_p9, %p1524_p4 }
  0x2c   : > { %1534 = shalt.err (!%p1531_p10)
}
  0x2d   : > { %s1755_s20 = smov 192   ;;  %s1756_s8 = smov 12  }
  0x2e   : > { %s2130_s3 = sld [smem:[#allocation27_spill]]  ;;  %s1757_s9 = smov [#allocation11]  }
  0x2f   : > { %s224_s17 = sshll.u32 %s1757_s9, 4  ;;  %s225_s17 = int_to_ptr.vmem [resolvable:$true] %s224_s17 }
  0x30   : > { %s1546_s18 = scalar_lea.vmem %s225_s17, 320  ;;  %p1554_p0 = scmp.lt.s32.totalorder %s225_s17, %s225_s17 }
  0x31   : > { %p1547_p11 = scmp.ne.s32.totalorder %s225_s17, %s1546_s18  ;;  %p1555_p2 = scmp.lt.s32.totalorder %s1546_s18, %s1546_s18 }
  0x33   : > { %p1549_p12 = pnand %p1547_p11, %p1871_p6  ;;  %p1556_p4 = por %p1555_p2, %p1554_p0 }
  0x34   : > { %1313 = dma.hbm_to_vmem [thread:$0]  (!%p1865_p5), %s2130_s3, 3072, %s238_s12, [#allocation13], %s1755_s20, %s1755_s20, %s1756_s8  }
  0x35   : > { %p1550_p13 = pneg %p1549_p12 }
  0x37   : > { %p1557_p7 = pnand %p1556_p4, %p1550_p13 }
  0x39   : > { %1560 = shalt.err (!%p1557_p7)
}
  0x3a   : > { %s1758_s19 = smov 64   ;;  %s1759_s29 = smov 4  }
  0x3b   : > { %s2131_s2 = sld [smem:[#allocation26_spill]]  ;;  %s1760_s20 = smov [#allocation14]  }
  0x3c   : > { %s250_s8 = sshll.u32 %s1760_s20, 4  ;;  %s1761_s14 = smov [#allocation15]   ;;  %s251_s8 = int_to_ptr.vmem [resolvable:$true] %s250_s8 }
  0x3d   : > { %s263_s9 = sshll.u32 %s1761_s14, 4  ;;  %s1572_s15 = scalar_lea.vmem %s251_s8, 256  ;;  %s264_s9 = int_to_ptr.vmem [resolvable:$true] %s263_s9 }
  0x3e   : > { %p1573_p8 = scmp.ne.s32.totalorder %s251_s8, %s1572_s15  ;;  %p1580_p11 = scmp.lt.s32.totalorder %s251_s8, %s251_s8 }
  0x3f   : > { %p1581_p12 = scmp.lt.s32.totalorder %s1572_s15, %s1572_s15 }
  0x40   : > { %p1575_p9 = pnand %p1573_p8, %p1871_p6 }
  0x41   : > { %1310 = dma.hbm_to_vmem [thread:$0]  (!%p1865_p5), %s2131_s2, 320, %s225_s17, [#allocation10], %s1758_s19, %s1758_s19, %s1759_s29  }
  0x42   : > { %p1576_p10 = pneg %p1575_p9  ;;  %p1582_p13 = por %p1581_p12, %p1580_p11 }
  0x44   : > { %p1583_p0 = pnand %p1582_p13, %p1576_p10 }
  0x46   : > { %1586 = shalt.err (!%p1583_p0)
}
  0x47   : > { %s2132_s18 = smov 128   ;;  %s2133_s4 = sld [smem:[#allocation28_spill]] }
  0x48   : > { %s1598_s19 = scalar_lea.vmem %s264_s9, 256  ;;  %p1606_p8 = scmp.lt.s32.totalorder %s264_s9, %s264_s9 }
  0x49   : > { %p1599_p2 = scmp.ne.s32.totalorder %s264_s9, %s1598_s19  ;;  %p1607_p9 = scmp.lt.s32.totalorder %s1598_s19, %s1598_s19 }
  0x4b   : > { %p1601_p4 = pnand %p1599_p2, %p1871_p6  ;;  %p1608_p10 = por %p1607_p9, %p1606_p8 }
  0x4d   : > { %1316 = dma.hbm_to_vmem [thread:$0]  (!%p1865_p5), %s2133_s4, 256, %s251_s8, [#allocation13], %s2132_s18, %s2132_s18, %s2117_s16  }
  0x4e   : > { %p1602_p7 = pneg %p1601_p4 }
  0x50   : > { %p1609_p11 = pnand %p1608_p10, %p1602_p7 }
  0x52   : > { %1612 = shalt.err (!%p1609_p11)
}
  0x53   : > { %s2134_s5 = sld [smem:[#allocation29_spill]]  ;;  %s1146_s10 = sadd.s32 4294967294, %s1749_s28  }
  0x54   : > { %s34_s13 = sadd.s32 1, %s1741_s26  ;;  %s37_s12 = sadd.s32 1, %s1745_s27 }
  0x55   : > { %p35_p6 = scmp.ge.s32.totalorder %s34_s13, 2  ;;  %s44_s20 = sadd.s32 1, %s1729_s23 }
  0x56   : > { %p51_p12 = scmp.ne.s32.totalorder %s1729_s23, %s1725_s22  ;;  %p52_p13 = scmp.eq.s32.totalorder %s1749_s28, 0 }
  0x57   : > { %s2156_s13 = smov (%p35_p6, %s34_s13), 0  ;;  %s2158_s12 = smov (!%p35_p6, %s37_s12), %s1745_s27 }
  0x58   : > { %2135 = sst [smem:[#allocation23_spill]] %s2156_s13  ;;  %p1929_p0 = por %p52_p13, %p51_p12 }
  0x59   : > { %1319 = dma.hbm_to_vmem [thread:$0]  (!%p1865_p5), %s2134_s5, 256, %s264_s9, [#allocation16], %s2132_s18, %s2132_s18, %s2117_s16  }
  0x5a   : > { %p57_p5 = scmp.ne.s32.totalorder %s1725_s22, %s1721_s21  ;;  %p39_p2 = scmp.ge.s32.totalorder %s2158_s12, 2 }
  0x5b   : > { %s2137_s14 = sadd.s32 4294967295, %s1749_s28   ;;  %p192_p8 = scmp.eq.s32.totalorder %s1146_s10, 3 }
  0x5c   : > { %p186_p4 = scmp.eq.s32.totalorder %s2137_s14, 3  ;;  %p1939_p7 = por %p1852_p1, %p57_p5 }
  0x5d   : > { %s2160_s12 = smov (%p39_p2, %s2158_s12), 0  ;;  %p1949_p10 = por %p192_p8, %p57_p5 }
  0x5e   : > { %2139 = sst [smem:[#allocation24_spill]] %s2160_s12  ;;  %p1945_p9 = por %p186_p4, %p51_p12 }
  0x5f   : > { %s2141_s17 = scalar_select %p1949_p10, 1, 0 }
  0x60   : > { %s2140_s29 = scalar_select %p1945_p9, 1, 0 }
  0x61   : > { %s41_s19 = ssub.s32 %s1745_s27, %s2160_s12  ;;  %p1333_p11 = scmp.lt.s32.totalorder %s1749_s28, 4 }
  0x62   : > { %p42_p6 = scmp.eq.s32.totalorder %s41_s19, 0  ;;  %s277_s15 = sand.u32 1, %s1729_s23  }
  0x63   : > { %s1154_s11 = sshll.u32 %s277_s15, 4  ;;  %s1212_s16 = sshll.u32 %s1745_s27, 8 }
  0x64   : > { %s1958_s14 = scalar_select %p42_p6, %s1729_s23, %s44_s20  }
  0x65   : > { %s287_s2 = scalar_lea.hbm %s2107_s0, %s1212_s16  ;;  %s281_s3 = scalar_lea.vmem [#allocation6], %s1154_s11 }
  0x66   : > { %s288_s4 = sshll.u32 %s281_s3, 4  ;;  %p1966_p12 = pnand %p1333_p11, %p1929_p0  ;;  %s289_s4 = int_to_ptr.vmem [resolvable:$true] %s288_s4 }
  0x67   : > { %s278_s12 = scalar_lea.sflag [#allocation7], %s277_s15  ;;  %s1626_s19 = scalar_lea.vmem %s289_s4, 256 }
  0x68   : > { %p1615_p13 = pneg %p1966_p12  ;;  %p1627_p5 = scmp.ne.s32.totalorder %s289_s4, %s1626_s19 }
  0x69   : > { %s1762_s20 = smov [#allocation6]  }
  0x6a   : > { %p1629_p2 = pnand %p1627_p5, %p1615_p13  ;;  %s1631_s13 = sshll.u32 %s1762_s20, 4  ;;  %s1632_s13 = int_to_ptr.vmem [resolvable:$false] %s1631_s13 }
  0x6b   : > { %s1633_s1 = scalar_lea.vmem %s1632_s13, 512  ;;  %p1634_p8 = scmp.lt.s32.totalorder %s289_s4, %s1632_s13 }
  0x6c   : > { %p1630_p4 = pneg %p1629_p2  ;;  %p1635_p6 = scmp.lt.s32.totalorder %s1633_s1, %s1626_s19 }
  0x6e   : > { %p1636_p10 = por %p1635_p6, %p1634_p8 }
  0x70   : > { %p1637_p9 = pnand %p1636_p10, %p1630_p4 }
  0x72   : > { %1640 = shalt.err (!%p1637_p9)
}
  0x73   : > { %s2143_s3 = smov 8   ;;  %300 = sbr.rel (%p1857_p3) target bundleno = 1628 (0x65c), region = 44 }
  0x74   : > { %1323 = dma.hbm_to_vmem [thread:$0]  (!%p1966_p12), %s287_s2, 256, %s289_s4, %s278_s12, %s2132_s18, %s2132_s18, %s2143_s3  }
  0x75   : > { %s1980_s16 = sand.u32 (!%p1857_p3), 1, %s1725_s22  }
  0x76   : > { %s1158_s13 = sshll.u32 (!%p1857_p3), %s1980_s16, 4  ;;  %s303_s8 = scalar_lea.sflag (!%p1857_p3), [#allocation7], %s1980_s16 }
  0x77   : > { %s1984_s15 = scalar_lea.vmem (!%p1857_p3), [#allocation6], %s1158_s13 }
  0x78   : > { %1700 = dma.done.wait (%p1939_p7), %s303_s8, 256  }
  0x79   : > { %1702 = vsyncadd (%p1939_p7), %s303_s8, 4294967040 }
  0x7a   : > { %1704 = dma.done.wait (%p1852_p1), [#allocation10], 960  }
  0x7b   : > { %1706 = vsyncadd (%p1852_p1), [#allocation10], 4294966336 }
  0x7c   : > { %1708 = dma.done.wait (%p1852_p1), [#allocation13], 3328  }
  0x7d   : > { %1710 = vsyncadd (%p1852_p1), [#allocation13], 4294963968 }
  0x7e   : > { %1712 = dma.done.wait (%p1852_p1), [#allocation16], 256  }
  0x7f   : > { %1714 = vsyncadd (%p1852_p1), [#allocation16], 4294967040  ;;  %s2002_s2 = scalar_lea.vmem [#allocation17], %s1158_s13  ;;  %p1165_p3 = scmp.ne.s32.totalorder %s1733_s24, 0 }
  0x81   : > { %361 = sbr.rel (%p1165_p3) target bundleno = 357 (0x165), region = 72 }
  0x86   : > { %v369_v0 = vld [vmem:[#allocation9 + $0x20] sm:$0x11]  ;;  %vm399_vm0 = vcmask 1040384   ;;  %v1763_v2 = vmov 0   ;;  %v1426_v7 = vld [vmem:[#allocation9 + $0x14] ss:$8 sps:$4 sm:$0xff]  }
  0x87   : > { %v1171_v1 = vcombine.high %v369_v0, %v369_v0  ;;  %v401_v3 = vsel %vm399_vm0, 65535, %v1763_v2  ;;  %v1170_v4 = vcombine.low %v369_v0, %v369_v0  ;;  %440 = vmatprep.mubr.bf16.mxu0 %v1763_v2  ;;  %v1428_v8 = vld [vmem:[#allocation9 + $0x10] ss:$8 sps:$4 sm:$0xff]   ;;  %v1429_v9 = vld [vmem:[#allocation9 + $0x4] ss:$8 sps:$4 sm:$0xff]   ;;  %vm395_vm1 = vcmask 269312  }
  0x88   : > { %v1431_v10 = vld [vmem:[#allocation9] ss:$8 sps:$4 sm:$0xff]   ;;  %vm471_vm2 = vcmask 7168   ;;  %v1764_v14 = vmov -inf   ;;  %v1765_v15 = vmov 0.0   ;;  %v455_v18 = vld [vmem:[#allocation15] sm:$0xff] }
  0x89   : > { %v406_v5 = vand.u32 %v1171_v1, %v401_v3  ;;  %v403_v6 = vand.u32 %v1170_v4, %v401_v3  ;;  %v362_v11 = vld [vmem:[%s1984_s15] sm:$0xff]  ;;  %v363_v12 = vld [vmem:[%s1984_s15 + $0x8] sm:$0xff]  ;;  %472 = vst.msk [vmem:[#allocation3] sm:$0xff] %vm471_vm2, %v1764_v14  ;;  %473 = vst.msk [vmem:[#allocation3 + $0x8] sm:$0xff] %vm471_vm2, %v1764_v14 }
  0x8a   : > { %v364_v13 = vpack.c.bf16 %v363_v12, %v362_v11  ;;  %474 = vst.msk [vmem:[#allocation4] sm:$0xff] %vm471_vm2, %v1765_v15  ;;  %475 = vst.msk [vmem:[#allocation4 + $0x8] sm:$0xff] %vm471_vm2, %v1765_v15  ;;  %v451_v19 = vld [vmem:[#allocation14] sm:$0xff]  ;;  %v452_v21 = vld [vmem:[#allocation14 + $0x8] sm:$0xff] }
  0x8b   : > { %418 = vmatprep.subr.bf16.mxu0 %v406_v5  ;;  %476 = vst [vmem:[#allocation5] sm:$0xff] %v1765_v15  ;;  %477 = vst [vmem:[#allocation5 + $0x8] sm:$0xff] %v1765_v15  ;;  %v456_v22 = vld [vmem:[#allocation15 + $0x8] sm:$0xff] }
  0x8c   : > { %419 = vmatpush1.bf16.msra.mxu0 %v403_v6 }
  0x8d   : > { %420 = vmatprep.subr.bf16.mxu0 %v1426_v7 }
  0x90   : > { %421 = vmatpush1.bf16.msra.mxu0 %v1428_v8 }
  0x91   : > { %422 = vmatprep.subr.bf16.mxu0 %v1429_v9 }
  0x94   : > { %423 = vmatpush1.bf16.msra.mxu0 %v1431_v10 }
  0x97   : > { %1172 = vmatmul.mubr.msk.bf16.vlgmr.msra.gmra.mxu0 %vm395_vm1, %v364_v13 }
 0x157   : > { %v442_v16 = vpop.f32.mrf.mxu0 }
 0x158   : > { %v453_v25 = vmul.f32 %v451_v19, %v442_v16 }
 0x159   : > { %v444_v17 = vpop.f32.mrf.mxu0 }
 0x15a   : > { %v457_v23 = vmul.f32 %v455_v18, %v444_v17 }
 0x15b   : > { %v446_v20 = vpop.f32.mrf.mxu0 }
 0x15c   : > { %v454_v26 = vmul.f32 %v452_v21, %v446_v20  ;;  %v459_v28 = vadd.f32 %v457_v23, %v453_v25 }
 0x15d   : > { %v448_v24 = vpop.f32.mrf.mxu0 }
 0x15e   : > { %v458_v27 = vmul.f32 %v456_v22, %v448_v24 }
 0x160   : > { %v460_v29 = vadd.f32 %v458_v27, %v454_v26 }
 0x162   : > { %v1219_v30 = vpack.c.bf16 %v460_v29, %v459_v28 }
 0x164   : > { %1220 = vst [vmem:[#allocation2] sm:$0xff] %v1219_v30  }
 0x165 PF: > { %v1434_v31 = vld [vmem:[#allocation11 + $0x10] ss:$0 sps:$4 sm:$0x11]   ;;  %v1766_v32 = vmov 0.0   ;;  %vm510_vm3 = vcmask 1040384   ;;  %v1767_v33 = vmov 0  }
 0x166   : > { %1238 = vmatprep.subr.bf16.mxu0 %v1766_v32  ;;  %v512_v34 = vsel %vm510_vm3, 65535, %v1767_v33  ;;  %749 = vmatprep.mubr.bf16.mxu1 %v1767_v33  ;;  %s2009_s4 = sshll.u32 %s1733_s24, 3  ;;  %vm1768_vm4 = vmmov 0   ;;  %v1437_v36 = vld [vmem:[#allocation12 + $0xac] ss:$12 sps:$4 sm:$0xff]   ;;  %vm506_vm5 = vcmask 269312  }
 0x167   : > { %1432 = vset.pattern.permute.xlu1 %v1767_v33  ;;  %v514_v35 = vand.u32 %v1434_v31, %v512_v34  ;;  %1433 = vset.pattern.permute.xlu0 %v1767_v33  ;;  %v1439_v37 = vld [vmem:[#allocation12 + $0xa8] ss:$12 sps:$4 sm:$0xff]   ;;  %s479_s5 = scalar_lea.vmem %s1984_s15, %s2009_s4 [#allocation6]  ;;  %v1443_v40 = vld [vmem:[#allocation12 + $0x90] ss:$12 sps:$4 sm:$0xff]   ;;  %v1447_v44 = vld [vmem:[#allocation12 + $0x78] ss:$12 sps:$4 sm:$0xff]  }
 0x168   : > { %1244 = vmatprep.mubr.msk.bf16.mxu0 %vm1768_vm4, %v1766_v32  ;;  %v1435_v38 = vld [vmem:[#allocation11 + $0x8] sm:$0xff]   ;;  %717 = vmatprep.subr.bf16.mxu1 %v1437_v36  ;;  %v1436_v41 = vld [vmem:[#allocation11] sm:$0xff]   ;;  %v1445_v43 = vld [vmem:[#allocation12 + $0x7c] ss:$12 sps:$4 sm:$0xff]   ;;  %s481_s30 = scalar_lea.vmem [#allocation14], %s2009_s4  ;;  %s483_s7 = scalar_lea.vmem [#allocation15], %s2009_s4 }
 0x169   : > { %1239 = vmatpush3.bf16.msra.mxu0 %v514_v35  ;;  %v1441_v39 = vld [vmem:[#allocation12 + $0x94] ss:$12 sps:$4 sm:$0xff]   ;;  %718 = vmatpush1.bf16.msra.mxu1 %v1439_v37  ;;  %v480_v42 = vld [vmem:[%s479_s5] sm:$0xff]  ;;  %v1444_v50 = vld [vmem:[#allocation12 + $0x98] ss:$12 sps:$4 sm:$0xff]   ;;  %vm918_vm6 = vcmask 1043456  }
 0x16a   : > { %1240 = vmatprep.subr.bf16.mxu0 %v1766_v32  ;;  %719 = vmatprep.subr.bf16.mxu1 %v1441_v39  ;;  %v485_v45 = vpack.c.bf16 %v480_v42, %v480_v42  ;;  %v1449_v46 = vld [vmem:[#allocation12 + $0x64] ss:$12 sps:$4 sm:$0xff]   ;;  %v1451_v48 = vld [vmem:[#allocation12 + $0x60] ss:$12 sps:$4 sm:$0xff]   ;;  %v1455_v52 = vld [vmem:[#allocation12 + $0x48] ss:$12 sps:$4 sm:$0xff]  }
 0x16b   : > { %v1440_v47 = vld [vmem:[#allocation12 + $0xb0] ss:$12 sps:$4 sm:$0xff]   ;;  %v1453_v49 = vld [vmem:[#allocation12 + $0x4c] ss:$12 sps:$4 sm:$0xff]   ;;  %v1457_v53 = vld [vmem:[#allocation12 + $0x34] ss:$12 sps:$4 sm:$0xff]  }
 0x16c   : > { %v1448_v51 = vld [vmem:[#allocation12 + $0x80] ss:$12 sps:$4 sm:$0xff]   ;;  %v1459_v54 = vld [vmem:[#allocation12 + $0x30] ss:$12 sps:$4 sm:$0xff]   ;;  %v1452_v56 = vld [vmem:[#allocation12 + $0x68] ss:$12 sps:$4 sm:$0xff]  }
 0x16d   : > { %1241 = vmatpush3.bf16.msra.mxu0 %v1435_v38  ;;  %720 = vmatpush1.bf16.msra.mxu1 %v1443_v40  ;;  %v1461_v55 = vld [vmem:[#allocation12 + $0x1c] ss:$12 sps:$4 sm:$0xff]   ;;  %v1463_v57 = vld [vmem:[#allocation12 + $0x18] ss:$12 sps:$4 sm:$0xff]   ;;  %v1464_v61 = vld [vmem:[#allocation12 + $0x20] ss:$12 sps:$4 sm:$0xff]  }
 0x16e   : > { %1242 = vmatprep.subr.bf16.mxu0 %v1766_v32  ;;  %721 = vmatprep.subr.bf16.mxu1 %v1445_v43  ;;  %v1465_v58 = vld [vmem:[#allocation12 + $0x4] ss:$12 sps:$4 sm:$0xff]   ;;  %v1467_v62 = vld [vmem:[#allocation12] ss:$12 sps:$4 sm:$0xff]   ;;  %v1468_v63 = vld [vmem:[#allocation12 + $0x8] ss:$12 sps:$4 sm:$0xff]  }
 0x16f   : > { %v1456_v59 = vld [vmem:[#allocation12 + $0x50] ss:$12 sps:$4 sm:$0xff]   ;;  %v1460_v60 = vld [vmem:[#allocation12 + $0x38] ss:$12 sps:$4 sm:$0xff]   ;;  %vm853_vm7 = vcmask 64512   ;;  %vm896_vm8 = vcmask 7168  }
 0x170   : > { %v482_v5 = vld [vmem:[%s481_s30] sm:$0xff]  ;;  %v851_v28 = vld [vmem:[#allocation3] sm:$0xff]  ;;  %v852_v31 = vld [vmem:[#allocation3 + $0x8] sm:$0xff]  ;;  %p1206_p1 = scmp.ne.s32.totalorder %s1733_s24, 1 }
 0x171   : > { %1243 = vmatpush3.bf16.msra.mxu0 %v1436_v41  ;;  %722 = vmatpush1.bf16.msra.mxu1 %v1447_v44  ;;  %v484_v8 = vld [vmem:[%s483_s7] sm:$0xff] }
 0x172   : > { %1248 = vmatprep.subr.bf16.mxu0 %v1766_v32  ;;  %723 = vmatprep.subr.bf16.mxu1 %v1449_v46  ;;  %v1469_v20 = vld [vmem:[#allocation2] sm:$0xff]  }
 0x174   : > { %1245 = vmatmul.mubr.msk.bf16.vlgmr.msra.gmra.mxu0 %vm506_vm5, %v485_v45 }
 0x175   : > { %1249 = vmatpush3.bf16.msra.mxu0 %v1440_v47  ;;  %1264 = vmatprep.mubr.msk.bf16.mxu0 %vm1768_vm4, %v1766_v32 }
 0x176   : > { %1250 = vmatprep.subr.bf16.mxu0 %v1766_v32  ;;  %724 = vmatpush1.bf16.msra.mxu1 %v1451_v48 }
 0x177   : > { %725 = vmatprep.subr.bf16.mxu1 %v1453_v49 }
 0x179   : > { %1251 = vmatpush3.bf16.msra.mxu0 %v1444_v50 }
 0x17a   : > { %1252 = vmatprep.subr.bf16.mxu0 %v1766_v32  ;;  %726 = vmatpush1.bf16.msra.mxu1 %v1455_v52 }
 0x17b   : > { %727 = vmatprep.subr.bf16.mxu1 %v1457_v53 }
 0x17d   : > { %1253 = vmatpush3.bf16.msra.mxu0 %v1448_v51  ;;  %v884_v51 = vld [vmem:[#allocation4] sm:$0xff] }
 0x17e   : > { %1254 = vmatprep.subr.bf16.mxu0 %v1766_v32  ;;  %728 = vmatpush1.bf16.msra.mxu1 %v1459_v54  ;;  %v885_v54 = vld [vmem:[#allocation4 + $0x8] sm:$0xff] }
 0x17f   : > { %729 = vmatprep.subr.bf16.mxu1 %v1461_v55 }
 0x181   : > { %1255 = vmatpush3.bf16.msra.mxu0 %v1452_v56 }
 0x182   : > { %1256 = vmatprep.subr.bf16.mxu0 %v1766_v32  ;;  %730 = vmatpush1.bf16.msra.mxu1 %v1463_v57 }
 0x183   : > { %731 = vmatprep.subr.bf16.mxu1 %v1465_v58 }
 0x185   : > { %1257 = vmatpush3.bf16.msra.mxu0 %v1456_v59  ;;  %v899_v59 = vld [vmem:[#allocation5] sm:$0xff] }
 0x186   : > { %1258 = vmatprep.subr.bf16.mxu0 %v1766_v32  ;;  %732 = vmatpush1.bf16.msra.mxu1 %v1467_v62  ;;  %v900_v62 = vld [vmem:[#allocation5 + $0x8] sm:$0xff] }
 0x187   : > { %1268 = vmatprep.subr.bf16.mxu1 %v1766_v32 }
 0x189   : > { %1259 = vmatpush3.bf16.msra.mxu0 %v1460_v60 }
 0x18a   : > { %1260 = vmatprep.subr.bf16.mxu0 %v1766_v32 }
 0x18d   : > { %1261 = vmatpush3.bf16.msra.mxu0 %v1464_v61 }
 0x18e   : > { %1262 = vmatprep.subr.bf16.mxu0 %v1766_v32 }
 0x191   : > { %1263 = vmatpush3.bf16.msra.mxu0 %v1468_v63 }
 0x234   : > { %v550_v0 = vpop.f32.mrf.mxu0 }
 0x235   : > { %v556_v1 = vpack.c.bf16 %v550_v0, %v550_v0 }
 0x236   : > { %v1246_v2 = vpop.f32.mrf.mxu0 }
 0x237   : > { %750 = vmatmul.mubr.bf16.vlgmr.msra.gmra.mxu1 %v556_v1  ;;  %1265 = vmatmul.mubr.bf16.vlgmr.msra.gmra.mxu0 %v556_v1 }
 0x238   : > { %v553_v3 = vpop.f32.mrf.mxu0  ;;  %1270 = vmatprep.mubr.msk.bf16.mxu1 %vm1768_vm4, %v1766_v32 }
 0x23a   : > { %v1247_v4 = vpop.f32.mrf.mxu0 }
 0x2f7   : > { %v751_v6 = vpop.f32.mrf.mxu1  ;;  %v792_v7 = vpop.f32.mrf.mxu0 }
 0x2f8   : > { %v798_v11 = vmul.f32 %v751_v6, %v482_v5  ;;  %v914_v19 = vpack.c.bf16 %v792_v7, %v792_v7 }
 0x2f9   : > { %v753_v9 = vpop.f32.mrf.mxu1  ;;  %v1266_v10 = vpop.f32.mrf.mxu0 }
 0x2fa   : > { %v799_v12 = vmul.f32 %v753_v9, %v484_v8  ;;  %v920_v21 = vsel %vm918_vm6, %v914_v19, 0 }
 0x2fb   : > { %v755_v13 = vpop.f32.mrf.mxu1  ;;  %v795_v14 = vpop.f32.mrf.mxu0 }
 0x2fc   : > { %v800_v15 = vadd.f32 %v799_v12, %v798_v11 }
 0x2fd   : > { %v756_v16 = vpop.f32.mrf.mxu1  ;;  %v1267_v17 = vpop.f32.mrf.mxu0 }
 0x2fe   : > { %v801_v18 = vpack.c.bf16 %v800_v15, %v800_v15 }
 0x300   : > { %1269 = vmatpush3.bf16.xpose.msra.mxu1 %v801_v18 }
 0x301   : > { %1274 = vmatprep.subr.bf16.mxu1 %v1766_v32 }
 0x307   : > { %1271 = vmatmul.mubr.bf16.vlgmr.msra.gmra.mxu1 %v1469_v20 }
 0x308   : > { %1275 = vmatpush3.bf16.msra.mxu1 %v920_v21  ;;  %1276 = vmatprep.mubr.msk.bf16.mxu1 %vm1768_vm4, %v1766_v32 }
 0x3c7   : > { %v844_v22 = vpop.f32.mrf.mxu1 }
 0x3c8   : > { %v854_v23 = vsel %vm853_vm7, %v844_v22, -inf }
 0x3c9   : > { %855 = vmax.xlane.f32.xlu0 %v854_v23  ;;  %v1272_v24 = vpop.f32.mrf.mxu1 }
 0x3cb   : > { %v847_v25 = vpop.f32.mrf.mxu1 }
 0x3cc   : > { %v857_v26 = vsel %vm853_vm7, %v847_v25, -inf }
 0x3cd   : > { %858 = vmax.xlane.f32.xlu0 %v857_v26  ;;  %v1273_v27 = vpop.f32.mrf.mxu1 }
 0x452   : > { %v856_v29 = vpop.xlane.xlu0 %855 }
 0x453   : > { %v860_v30 = vmax.f32 %v851_v28, %v856_v29 }
 0x455   : > { %v862_v33 = vsub.f32 %v851_v28, %v860_v30  ;;  %967 = vst.msk [vmem:[#allocation3] sm:$0xff] %vm896_vm8, %v860_v30  ;;  %870 = vperm.xlu1 %1432, %v860_v30  }
 0x456   : > { %v859_v32 = vpop.xlane.xlu0 %858 }
 0x457   : > { %v861_v34 = vmax.f32 %v852_v31, %v859_v32  ;;  %v864_v48 = vmul.f32 1.442695, %v862_v33 }
 0x459   : > { %v863_v35 = vsub.f32 %v852_v31, %v861_v34  ;;  %968 = vst.msk [vmem:[#allocation3 + $0x8] sm:$0xff] %vm896_vm8, %v861_v34  ;;  %875 = vperm.xlu1 %1432, %v861_v34  }
 0x45b   : > { %v866_v45 = vmul.f32 1.442695, %v863_v35 }
 0x4d0   : > { %v871_v36 = vpop.permute.xlu1 %870 }
 0x4d1   : > { %v878_v37 = vsub.f32 %v844_v22, %v871_v36 }
 0x4d3   : > { %v880_v38 = vmul.f32 1.442695, %v878_v37 }
 0x4d4   : > { %v876_v39 = vpop.permute.xlu1 %875 }
 0x4d5   : > { %1470 = vpow2.f32 %v880_v38  ;;  %v879_v40 = vsub.f32 %v847_v25, %v876_v39 }
 0x4d7   : > { %v882_v41 = vmul.f32 1.442695, %v879_v40 }
 0x4d9   : > { %1472 = vpow2.f32 %v882_v41 }
 0x4da   : > { %1474 = vpow2.f32 %v866_v45 }
 0x4db   : > { %1476 = vpow2.f32 %v864_v48 }
 0x4e2   : > { %v1471_v42 = vpop.eup %1470 }
 0x4e3   : > { %v888_v43 = vsel %vm853_vm7, %v1471_v42, 0.0 }
 0x4e4   : > { %889 = vadd.xlane.f32.xlu0 %v888_v43 }
 0x4e6   : > { %v1473_v44 = vpop.eup %1472 }
 0x4e7   : > { %v891_v46 = vsel %vm853_vm7, %v1473_v44, 0.0  ;;  %v913_v47 = vpack.c.bf16 %v1473_v44, %v1471_v42  ;;  %v1475_v49 = vpop.eup %1474 }
 0x4e8   : > { %892 = vadd.xlane.f32.xlu1 %v891_v46  ;;  %v1477_v50 = vpop.eup %1476  ;;  %v887_v56 = vmul.f32 %v1475_v49, %v885_v54 }
 0x4e9   : > { %1277 = vmatmul.mubr.msk.bf16.vlgmr.msra.gmra.mxu1 %vm853_vm7, %v913_v47  ;;  %v886_v52 = vmul.f32 %v1477_v50, %v884_v51 }
 0x4f9   : > { %908 = vperm.xlu1 %1432, %v1475_v49  }
 0x4fa   : > { %903 = vperm.xlu0 %1433, %v1477_v50  }
 0x56d   : > { %v890_v53 = vpop.xlane.xlu0 %889 }
 0x56e   : > { %v894_v55 = vadd.f32 %v890_v53, %v886_v52 }
 0x570   : > { %897 = vst.msk [vmem:[#allocation4] sm:$0xff] %vm896_vm8, %v894_v55 }
 0x571   : > { %v893_v57 = vpop.xlane.xlu1 %892 }
 0x572   : > { %v895_v58 = vadd.f32 %v893_v57, %v887_v56 }
 0x574   : > { %898 = vst.msk [vmem:[#allocation4 + $0x8] sm:$0xff] %vm896_vm8, %v895_v58 }
 0x575   : > { %v904_v60 = vpop.permute.xlu0 %903  ;;  %v909_v63 = vpop.permute.xlu1 %908 }
 0x576   : > { %v911_v61 = vmul.f32 %v904_v60, %v899_v59  ;;  %v912_v3 = vmul.f32 %v909_v63, %v900_v62 }
 0x5a9   : > { %v956_v0 = vpop.f32.mrf.mxu1 }
 0x5aa   : > { %v963_v1 = vadd.f32 %v956_v0, %v911_v61 }
 0x5ab   : > { %v1278_v2 = vpop.f32.mrf.mxu1 }
 0x5ac   : > { %965 = vst [vmem:[#allocation5] sm:$0xff] %v963_v1  ;;  %972 = sbr.rel (%p1206_p1) target bundleno = 1603 (0x643), region = 76 }
 0x5ad   : > { %v959_v4 = vpop.f32.mrf.mxu1 }
 0x5ae   : > { %v964_v5 = vadd.f32 %v959_v4, %v912_v3 }
 0x5af   : > { %v1279_v6 = vpop.f32.mrf.mxu1 }
 0x5b0   : > { %966 = vst [vmem:[#allocation5 + $0x8] sm:$0xff] %v964_v5 }
 0x5b1   : > { %v975_v7 = vld [vmem:[#allocation4] sm:$0xff]  ;;  %v976_v8 = vld [vmem:[#allocation4 + $0x8] sm:$0xff]  ;;  %v1769_v9 = vmov 0  }
 0x5b2   : > { %1478 = vset.pattern.permute.xlu0 %v1769_v9  ;;  %1479 = vrcp.f32 %v975_v7 }
 0x5b3   : > { %1481 = vrcp.f32 %v976_v8  ;;  %v973_v12 = vld [vmem:[#allocation5] sm:$0xff] }
 0x5b7   : > { %v974_v15 = vld [vmem:[#allocation5 + $0x8] sm:$0xff] }
 0x5bf   : > { %v1480_v10 = vpop.eup %1479 }
 0x5c0   : > { %981 = vperm.xlu0 %1478, %v1480_v10   ;;  %v1482_v11 = vpop.eup %1481 }
 0x5c4   : > { %986 = vperm.xlu0 %1478, %v1482_v11  }
 0x63b   : > { %v982_v13 = vpop.permute.xlu0 %981 }
 0x63c   : > { %v989_v14 = vmul.f32 %v982_v13, %v973_v12 }
 0x63e   : > { %991 = vst [vmem:[%s2002_s2] sm:$0xff] %v989_v14 }
 0x63f   : > { %v987_v16 = vpop.permute.xlu0 %986 }
 0x640   : > { %v990_v17 = vmul.f32 %v987_v16, %v974_v15 }
 0x642   : > { %992 = vst [vmem:[%s2002_s2 + $0x8] sm:$0xff] %v990_v17 }
 0x643 PF: > { %s1215_s24 = sshll.u32 %s1737_s25, 8  ;;  %s1007_s11 = sshll.u32 %s2002_s2, 4  ;;  %s2054_s11 = int_to_ptr.vmem [resolvable:$true] %s1007_s11 }
 0x644   : > { %s2051_s9 = scalar_lea.hbm %s2113_s6, %s1215_s24  ;;  %s994_s10 = scalar_lea.sflag [#allocation8], %s1980_s16 }
 0x645   : > { %s1641_s19 = scalar_lea.vmem %s2054_s11, 256  ;;  %p2144_p7 = scmp.ne.s32.totalorder %s2140_s29, 0 }
 0x646   : > { %p1642_p0 = scmp.ne.s32.totalorder %s2054_s11, %s1641_s19  ;;  %s1770_s20 = smov [#allocation17]  }
 0x647   : > { %s1645_s1 = sshll.u32 %s1770_s20, 4  ;;  %s1646_s1 = int_to_ptr.vmem [resolvable:$false] %s1645_s1 }
 0x648   : > { %p1643_p9 = pnand %p1642_p0, %p2144_p7  ;;  %s1647_s25 = scalar_lea.vmem %s1646_s1, 512 }
 0x649   : > { %p1648_p11 = scmp.lt.s32.totalorder %s2054_s11, %s1646_s1  ;;  %p1649_p12 = scmp.lt.s32.totalorder %s1647_s25, %s1641_s19 }
 0x64a   : > { %p1644_p10 = pneg %p1643_p9 }
 0x64b   : > { %p1650_p13 = por %p1649_p12, %p1648_p11 }
 0x64d   : > { %p1651_p5 = pnand %p1650_p13, %p1644_p10 }
 0x64f   : > { %1654 = shalt.err (!%p1651_p5)
}
 0x650   : > { %s1655_s3 = scalar_lea.hbm %s2051_s9, 256  ;;  %s1659_s15 = scalar_lea.hbm %s2113_s6, 512 }
 0x651   : > { %p1656_p2 = scmp.ne.s32.totalorder %s2051_s9, %s1655_s3  ;;  %p1660_p6 = scmp.lt.s32.totalorder %s2051_s9, %s2113_s6 }
 0x652   : > { %p1661_p3 = scmp.lt.s32.totalorder %s1659_s15, %s1655_s3 }
 0x653   : > { %p1657_p4 = pnand %p1656_p2, %p2144_p7 }
 0x654   : > { %p1662_p1 = por %p1661_p3, %p1660_p6 }
 0x655   : > { %p1658_p8 = pneg %p1657_p4 }
 0x657   : > { %p1663_p0 = pnand %p1662_p1, %p1658_p8 }
 0x659   : > { %1666 = shalt.err (!%p1663_p0)
}
 0x65a   : > { %s1771_s5 = smov 128   ;;  %s1772_s30 = smov 8  }
 0x65b   : > { %1302 = dma.vmem_to_hbm [thread:$0]  (%p2144_p7), %s2054_s11, 256, %s2051_s9, %s994_s10, %s1771_s5, %s1771_s5, %s1772_s30  }
 0x65c PF: > { %p1339_p9 = scmp.ge.s32.totalorder %s1749_s28, 2  ;;  %s1022_s7 = sand.u32 1, %s1721_s21  }
 0x65d   : > { %p2145_p10 = scmp.ne.s32.totalorder %s2141_s17, 0  ;;  %s1023_s24 = scalar_lea.sflag [#allocation8], %s1022_s7 }
 0x65f   : > { %p1325_p11 = pnand %p1339_p9, %p2145_p10 }
 0x661   : > { %p1326_p12 = pneg %p1325_p11 }
 0x663   : > { %1716 = dma.done.wait (%p1326_p12), %s1023_s24, 256  }
 0x664   : > { %1718 = vsyncadd (%p1326_p12), %s1023_s24, 4294967040  ;;  %s25_s28 = sadd.s32 1, %s1749_s28   ;;  %s2146_s29 = sld [smem:[#allocation23_spill]] }
 0x665   : > { %p22_p13 = scmp.ge.s32.totalorder %s25_s28, 6   ;;  %s2147_s16 = sld [smem:[#allocation24_spill]] }
 0x666   : > { %s2148_s21 = smov %s1725_s22  ;;  %s2149_s22 = smov %s1729_s23 }
 0x667   : > { %s2150_s23 = smov %s1958_s14  ;;  %s2151_s24 = smov %s1741_s26 }
 0x668   : > { %s2152_s25 = smov %s1745_s27  ;;  %24 = sbr.rel (!%p22_p13) target bundleno = 16 (0x10), region = 120 }
 0x66a   : > { %s2153_s26 = smov %s2146_s29 }
 0x66b   : > { %s2154_s27 = smov %s2147_s16 }
 0x66d   :  { %1028 = vsyncpa [#allocation7], 1 }
 0x66e   :  { %1030 = vsyncpa [#allocation7 + $0x1], 1 }
 0x66f   :  { %1031 = vsyncpa [#allocation10], 1 }
 0x670   :  { %1032 = vsyncpa [#allocation13], 1 }
 0x671   :  { %1033 = vsyncpa [#allocation16], 1 }
 0x672   :  { %1034 = vsyncpa [#allocation8], 1 }
 0x673   :  { %1036 = vsyncpa [#allocation8 + $0x1], 1 }

</bundles_post_ra>
